<compile_context>
chip_gen: v7x
topology: tpu7x:2x2x1
jax: 0.10.0
libtpu: 0.0.40
codegen_flags: <defaults>
</compile_context>

<pallas_src>
import jax
import jax.numpy as jnp
from jax import lax
from jax.experimental import pallas as pl
from jax.experimental.pallas import tpu as pltpu

# ------------------------- model hyper-params (small) -------------------------
B = 2            # batch
S = 8            # lyrics / song-structure sequence length (context length)
T = 8            # chord token sequence length
JOINT = 16       # prompt_encoder.joint_embedding_dim
STRUCT = 16      # song_structure_encoder.dim
D = JOINT + STRUCT          # transformer model dim (32)
MLP_HIDDEN = 32             # prompt_mlp hidden dim
NUM_LAYERS = 2              # gen_hparams['num_layers']
NUM_HEADS = 2               # gen_hparams['num_heads']
FFN_HIDDEN = 64             # gen_hparams['hidden_dim']
VOCAB = 32                  # tokenizer.vocab_size
VOCAB_PAD = 128             # lane-dense padded vocab for the output store
BLK = S + T                 # per-batch sequence block (16)
N_TOT = B * BLK             # flattened sequence length (32)
N_CTX = B * S               # total context rows (16)
HD = D // NUM_HEADS         # head dim (16)
NH_N = NUM_HEADS * N_TOT    # head-stacked rows (64)

# shift-based mask arithmetic requires these to be powers of two
assert S == T and (S & (S - 1)) == 0
assert (B & (B - 1)) == 0 and (N_TOT & (N_TOT - 1)) == 0
_LOG2_S = S.bit_length() - 1        # 3
_LOG2_NCTX = N_CTX.bit_length() - 1  # 4


# ------------------------------ Pallas kernel ---------------------------------
def _rmsnorm(x, w):
    ms = jnp.mean(x * x, axis=-1, keepdims=True)
    return x * lax.rsqrt(ms + 1e-6) * w


def chords_forward_kernel(txt_ref, lyr_ref, tok_ref,
                          w1_ref, b1_ref, w2_ref, b2_ref,
                          emb_ref, wqkv_ref, wo_ref, wf1_ref, wf2_ref,
                          ln1_ref, ln2_ref, lnf_ref, wout_ref,
                          o_ref,
                          h_ref, qblk_ref):
    """Whole ChordsGenerator forward for the full (folded) batch."""
    f32 = jnp.float32

    # ---------------- prompt MLP: gelu(x @ w1 + b1) @ w2 + b2 -----------------
    x_txt = txt_ref[...].astype(f32)                                  # [B, JOINT]
    h1 = jnp.dot(x_txt, w1_ref[...], preferred_element_type=f32) + b1_ref[...]
    h1 = jax.nn.gelu(h1)   # tanh-approx GELU (see TODO at top of file)
    prompt_emb = (jnp.dot(h1, w2_ref[...], preferred_element_type=f32)
                  + b2_ref[...])                                      # [B, JOINT]

    # ------------- token embeddings: ONE one-hot matmul -----------------------
    tok = tok_ref[...]                                                # [B*T, 1] i32
    viota = lax.broadcasted_iota(jnp.int32, (B * T, VOCAB), 1)
    onehot = (tok == viota).astype(f32)                               # [B*T, VOCAB]
    tok_emb = jnp.dot(onehot, emb_ref[...].astype(f32),
                      preferred_element_type=f32)                     # [B*T, D]

    # ------------- assemble hidden (contexts first, tokens last) --------------
    # rows [0, B*S)   : context (prompt-broadcast || structure embedding)
    # rows [B*S, N)   : chord-token embeddings
    for b in range(B):
        h_ref[b * S:(b + 1) * S, 0:JOINT] = jnp.broadcast_to(
            prompt_emb[b:b + 1, :], (S, JOINT))
    h_ref[0:N_CTX, JOINT:D] = lyr_ref[...].astype(f32)                # [B*S, STRUCT]
    h_ref[N_CTX:N_TOT, :] = tok_emb
    h = h_ref[...]                                                    # [N_TOT, D]

    # ---------------- constants, computed ONCE ---------------------------------
    scale = 1.0 / (HD ** 0.5)
    dcol = lax.broadcasted_iota(jnp.int32, (1, D), 1)
    head_sel = [((dcol >= hh * HD) & (dcol < (hh + 1) * HD)).astype(f32)
                for hh in range(NUM_HEADS)]                           # [1, D] each
    head_sel_scaled = [hs * scale for hs in head_sel]

    # Additive mask on the head-stacked [2N, N] score tile: same batch block
    # AND causal; power-of-two shapes -> shifts only (no integer divide).
    row = lax.broadcasted_iota(jnp.int32, (NH_N, N_TOT), 0)
    col = lax.broadcasted_iota(jnp.int32, (NH_N, N_TOT), 1)
    qi = row & (N_TOT - 1)                                            # query index

    def _batch(x):
        return (x >> _LOG2_S) & (B - 1)

    def _pos(x):
        return (x & (S - 1)) + ((x >> _LOG2_NCTX) << _LOG2_S)

    allowed = (_batch(qi) == _batch(col)) & (_pos(col) <= _pos(qi))
    madd = jnp.where(allowed, 0.0, -1e30).astype(f32)                 # [2N, N]
    # TODO(synk): if the reference Generator uses a fully-visible (prefix-LM)
    # context, additionally allow _pos(col) < S within the same batch block.

    for l in range(NUM_LAYERS):
        # ---------------- self attention (block-diag heads, fused QKV) --------
        x = _rmsnorm(h, ln1_ref[l])
        qkv = jnp.dot(x, wqkv_ref[l], preferred_element_type=f32)     # [N, 3D]
        q = qkv[:, 0:D]
        k = qkv[:, D:2 * D]
        v = qkv[:, 2 * D:3 * D]

        # head-block-diagonal Q (scale folded into the head column mask)
        for hh in range(NUM_HEADS):
            qblk_ref[hh * N_TOT:(hh + 1) * N_TOT, :] = q * head_sel_scaled[hh]

        # one QK^T dot for all heads; contract dim 1 with dim 1 (no explicit .T)
        s = lax.dot_general(qblk_ref[...], k, (((1,), (1,)), ((), ())),
                            preferred_element_type=f32)               # [2N, N]
        s = s + madd
        s = s - jnp.max(s, axis=-1, keepdims=True)
        p = jnp.exp(s)
        p = p * pl.reciprocal(jnp.sum(p, axis=-1, keepdims=True), approx=True)

        # one PV dot for all heads; then per-head column select + add (VPU only)
        ov = jnp.dot(p, v, preferred_element_type=f32)                # [2N, D]
        attn = ov[0:N_TOT, :] * head_sel[0]
        for hh in range(1, NUM_HEADS):
            attn = attn + ov[hh * N_TOT:(hh + 1) * N_TOT, :] * head_sel[hh]

        h = h + jnp.dot(attn, wo_ref[l], preferred_element_type=f32)

        # ---------------- feed forward (SiLU) ---------------------------------
        x = _rmsnorm(h, ln2_ref[l])
        ff = jnp.dot(x, wf1_ref[l], preferred_element_type=f32)
        ff = ff * jax.nn.sigmoid(ff)
        h = h + jnp.dot(ff, wf2_ref[l], preferred_element_type=f32)

    # ----- head: only the chord-token rows (one contiguous tail slice) --------
    x_tok = _rmsnorm(h[N_CTX:N_TOT, :], lnf_ref[...])                 # [B*T, D]
    logits = jnp.dot(x_tok, wout_ref[...], preferred_element_type=f32)
    o_ref[...] = logits.astype(o_ref.dtype)                           # [B*T, 128]


# ------------------------------ python wrapper ---------------------------------
@jax.jit
def chords_generator_forward(all_tokens, text_prompt_embedding, lyrics_embedding,
                             mlp_params, gen_params):
    """Equivalent of ChordsGenerator.forward(...) -> {'logits': [B, T, VOCAB]}."""
    w1, b1, w2, b2 = mlp_params
    (emb, wqkv, wo, wf1, wf2, ln1, ln2, lnf, wout_pad) = gen_params

    # contiguous reshapes only (metadata-level); all prepacking done at init
    tok_flat = all_tokens.reshape(B * T, 1).astype(jnp.int32)
    lyr_flat = lyrics_embedding.reshape(B * S, STRUCT)

    vmem_spec = pl.BlockSpec(memory_space=pltpu.MemorySpace.VMEM)
    logits_pad = pl.pallas_call(
        chords_forward_kernel,
        out_shape=jax.ShapeDtypeStruct((B * T, VOCAB_PAD), jnp.float32),
        in_specs=[vmem_spec] * 16,
        out_specs=vmem_spec,
        scratch_shapes=[pltpu.VMEM((N_TOT, D), jnp.float32),    # hidden assembly
                        pltpu.VMEM((NH_N, D), jnp.float32)],    # block-diag Q
        cost_estimate=pl.CostEstimate(flops=2_200_000,
                                      transcendentals=12_000,
                                      bytes_accessed=120_000),
    )(text_prompt_embedding, lyr_flat, tok_flat,
      w1, b1, w2, b2, emb, wqkv, wo, wf1, wf2, ln1, ln2, lnf, wout_pad)

    logits = logits_pad.reshape(B, T, VOCAB_PAD)[:, :, :VOCAB]
    return {"logits": logits}


# ------------------------------ parameter init ---------------------------------
def init_params(key):
    ks = jax.random.split(key, 16)
    sc = 0.02
    mlp_params = (
        sc * jax.random.normal(ks[0], (JOINT, MLP_HIDDEN), jnp.float32),
        jnp.zeros((1, MLP_HIDDEN), jnp.float32),
        sc * jax.random.normal(ks[1], (MLP_HIDDEN, JOINT), jnp.float32),
        jnp.zeros((1, JOINT), jnp.float32),
    )
    wq = sc * jax.random.normal(ks[3], (NUM_LAYERS, D, D), jnp.float32)
    wk = sc * jax.random.normal(ks[4], (NUM_LAYERS, D, D), jnp.float32)
    wv = sc * jax.random.normal(ks[5], (NUM_LAYERS, D, D), jnp.float32)
    wout = sc * jax.random.normal(ks[9], (D, VOCAB), jnp.float32)
    # prepack once (hoisted out of the per-call jitted forward):
    wqkv = jnp.concatenate([wq, wk, wv], axis=-1)                    # [L, D, 3D]
    wout_pad = jnp.pad(wout, ((0, 0), (0, VOCAB_PAD - VOCAB)))       # [D, 128]
    gen_params = (
        sc * jax.random.normal(ks[2], (VOCAB, D), jnp.float32),                   # emb
        wqkv,                                                                     # fused QKV
        sc * jax.random.normal(ks[6], (NUM_LAYERS, D, D), jnp.float32),           # wo
        sc * jax.random.normal(ks[7], (NUM_LAYERS, D, FFN_HIDDEN), jnp.float32),  # wf1
        sc * jax.random.normal(ks[8], (NUM_LAYERS, FFN_HIDDEN, D), jnp.float32),  # wf2
        jnp.ones((NUM_LAYERS, 1, D), jnp.float32),                                # ln1
        jnp.ones((NUM_LAYERS, 1, D), jnp.float32),                                # ln2
        jnp.ones((1, D), jnp.float32),                                            # lnf
        wout_pad,                                                                 # padded head
    )
    return mlp_params, gen_params


# ----------------------------------- main ---------------------------------------
if __name__ == "__main__":
    key = jax.random.PRNGKey(0)
    k_par, k_txt, k_lyr, k_tok = jax.random.split(key, 4)

    mlp_params, gen_params = init_params(k_par)

    # synthetic deterministic inputs:
    #   text_prompt_embedding  <- prompt_encoder.get_text_prompt_embeddings(...)
    #   lyrics_embedding       <- song_structure_encoder(lyrics)
    text_prompt_embedding = jax.random.normal(k_txt, (B, JOINT), jnp.float32)
    lyrics_embedding = jax.random.normal(k_lyr, (B, S, STRUCT), jnp.float32)
    all_tokens = jax.random.randint(k_tok, (B, T), 0, VOCAB, dtype=jnp.int32)

    out = chords_generator_forward(all_tokens, text_prompt_embedding,
                                   lyrics_embedding, mlp_params, gen_params)
    logits = jax.block_until_ready(out["logits"])
    assert logits.shape == (B, T, VOCAB)
    assert bool(jnp.all(jnp.isfinite(logits)))
    print("KERNEL_OK")
</pallas_src>

<mosaic_0001>
module attributes {stable_mosaic.version = 11 : i64} {
  func.func @chords_forward_kernel(%arg0: memref<2x16xf32, #tpu.memory_space<vmem>>, %arg1: memref<16x16xf32, #tpu.memory_space<vmem>>, %arg2: memref<16x1xi32, #tpu.memory_space<vmem>>, %arg3: memref<16x32xf32, #tpu.memory_space<vmem>>, %arg4: memref<1x32xf32, #tpu.memory_space<vmem>>, %arg5: memref<32x16xf32, #tpu.memory_space<vmem>>, %arg6: memref<1x16xf32, #tpu.memory_space<vmem>>, %arg7: memref<32x32xf32, #tpu.memory_space<vmem>>, %arg8: memref<2x32x96xf32, #tpu.memory_space<vmem>>, %arg9: memref<2x32x32xf32, #tpu.memory_space<vmem>>, %arg10: memref<2x32x64xf32, #tpu.memory_space<vmem>>, %arg11: memref<2x64x32xf32, #tpu.memory_space<vmem>>, %arg12: memref<2x1x32xf32, #tpu.memory_space<vmem>>, %arg13: memref<2x1x32xf32, #tpu.memory_space<vmem>>, %arg14: memref<1x32xf32, #tpu.memory_space<vmem>>, %arg15: memref<32x128xf32, #tpu.memory_space<vmem>>, %arg16: memref<16x128xf32, #tpu.memory_space<vmem>>, %arg17: memref<32x32xf32, #tpu.memory_space<vmem>>, %arg18: memref<64x32xf32, #tpu.memory_space<vmem>>) attributes {dimension_semantics = [], scalar_prefetch = 0 : i64, scratch_operands = 2 : i64, tpu.core_type = #tpu.core_type<tc>} {
    %c0 = arith.constant 0 : index
    %c0_0 = arith.constant 0 : index
    %0 = vector.load %arg0[%c0, %c0_0] : memref<2x16xf32, #tpu.memory_space<vmem>>, vector<2x16xf32>
    %c0_1 = arith.constant 0 : index
    %c0_2 = arith.constant 0 : index
    %1 = vector.load %arg3[%c0_1, %c0_2] : memref<16x32xf32, #tpu.memory_space<vmem>>, vector<16x32xf32>
    %cst = arith.constant dense<0.000000e+00> : vector<2x32xf32>
    %2 = tpu.matmul %0, %1, %cst {dimension_numbers = #tpu.dot_dimension_numbers<[1], [0], [0], [1], [0, 0, 1, 1], [], []>} : vector<2x16xf32>, vector<16x32xf32>, vector<2x32xf32> -> vector<2x32xf32>
    %c0_3 = arith.constant 0 : index
    %c0_4 = arith.constant 0 : index
    %3 = vector.load %arg4[%c0_3, %c0_4] : memref<1x32xf32, #tpu.memory_space<vmem>>, vector<1x32xf32>
    %4 = vector.broadcast %3 : vector<1x32xf32> to vector<2x32xf32>
    %5 = arith.addf %2, %4 : vector<2x32xf32>
    %6 = arith.mulf %5, %5 : vector<2x32xf32>
    %7 = arith.mulf %5, %6 : vector<2x32xf32>
    %cst_5 = arith.constant 4.471500e-02 : f32
    %8 = vector.broadcast %cst_5 : f32 to vector<2x32xf32>
    %9 = arith.mulf %8, %7 : vector<2x32xf32>
    %10 = arith.addf %5, %9 : vector<2x32xf32>
    %cst_6 = arith.constant 0.797884583 : f32
    %11 = vector.broadcast %cst_6 : f32 to vector<2x32xf32>
    %12 = arith.mulf %11, %10 : vector<2x32xf32>
    %13 = math.tanh %12 : vector<2x32xf32>
    %cst_7 = arith.constant 1.000000e+00 : f32
    %14 = vector.broadcast %cst_7 : f32 to vector<2x32xf32>
    %15 = arith.addf %14, %13 : vector<2x32xf32>
    %cst_8 = arith.constant 5.000000e-01 : f32
    %16 = vector.broadcast %cst_8 : f32 to vector<2x32xf32>
    %17 = arith.mulf %16, %15 : vector<2x32xf32>
    %18 = arith.mulf %5, %17 : vector<2x32xf32>
    %c0_9 = arith.constant 0 : index
    %c0_10 = arith.constant 0 : index
    %19 = vector.load %arg5[%c0_9, %c0_10] : memref<32x16xf32, #tpu.memory_space<vmem>>, vector<32x16xf32>
    %cst_11 = arith.constant dense<0.000000e+00> : vector<2x16xf32>
    %20 = tpu.matmul %18, %19, %cst_11 {dimension_numbers = #tpu.dot_dimension_numbers<[1], [0], [0], [1], [0, 0, 1, 1], [], []>} : vector<2x32xf32>, vector<32x16xf32>, vector<2x16xf32> -> vector<2x16xf32>
    %c0_12 = arith.constant 0 : index
    %c0_13 = arith.constant 0 : index
    %21 = vector.load %arg6[%c0_12, %c0_13] : memref<1x16xf32, #tpu.memory_space<vmem>>, vector<1x16xf32>
    %22 = vector.broadcast %21 : vector<1x16xf32> to vector<2x16xf32>
    %23 = arith.addf %20, %22 : vector<2x16xf32>
    %c0_14 = arith.constant 0 : index
    %c0_15 = arith.constant 0 : index
    %24 = vector.load %arg2[%c0_14, %c0_15] : memref<16x1xi32, #tpu.memory_space<vmem>>, vector<16x1xi32>
    %25 = tpu.iota {dimensions = array<i32: 1>} : vector<16x32xi32>
    %26 = vector.broadcast %24 : vector<16x1xi32> to vector<16x32xi32>
    %27 = arith.cmpi eq, %26, %25 : vector<16x32xi32>
    %28 = arith.extui %27 : vector<16x32xi1> to vector<16x32xi32>
    %29 = arith.sitofp %28 : vector<16x32xi32> to vector<16x32xf32>
    %c0_16 = arith.constant 0 : index
    %c0_17 = arith.constant 0 : index
    %30 = vector.load %arg7[%c0_16, %c0_17] : memref<32x32xf32, #tpu.memory_space<vmem>>, vector<32x32xf32>
    %cst_18 = arith.constant dense<0.000000e+00> : vector<16x32xf32>
    %31 = tpu.matmul %29, %30, %cst_18 {dimension_numbers = #tpu.dot_dimension_numbers<[1], [0], [0], [1], [0, 0, 1, 1], [], []>} : vector<16x32xf32>, vector<32x32xf32>, vector<16x32xf32> -> vector<16x32xf32>
    %32 = vector.extract_strided_slice %23 {offsets = [0, 0], sizes = [1, 16], strides = [1, 1]} : vector<2x16xf32> to vector<1x16xf32>
    %33 = vector.shape_cast %32 : vector<1x16xf32> to vector<1x16xf32>
    %34 = vector.broadcast %33 : vector<1x16xf32> to vector<8x16xf32>
    %c0_19 = arith.constant 0 : index
    %c0_20 = arith.constant 0 : index
    %35 = vector.load %arg17[%c0_19, %c0_20] : memref<32x32xf32, #tpu.memory_space<vmem>>, vector<8x16xf32>
    tpu.vector_store %arg17[%c0_19, %c0_20], %34 {strides = array<i32>} : memref<32x32xf32, #tpu.memory_space<vmem>>, vector<8x16xf32>,
    %36 = vector.extract_strided_slice %23 {offsets = [1, 0], sizes = [1, 16], strides = [1, 1]} : vector<2x16xf32> to vector<1x16xf32>
    %37 = vector.shape_cast %36 : vector<1x16xf32> to vector<1x16xf32>
    %38 = vector.broadcast %37 : vector<1x16xf32> to vector<8x16xf32>
    %c8 = arith.constant 8 : index
    %c0_21 = arith.constant 0 : index
    %39 = vector.load %arg17[%c8, %c0_21] : memref<32x32xf32, #tpu.memory_space<vmem>>, vector<8x16xf32>
    tpu.vector_store %arg17[%c8, %c0_21], %38 {strides = array<i32>} : memref<32x32xf32, #tpu.memory_space<vmem>>, vector<8x16xf32>,
    %c0_22 = arith.constant 0 : index
    %c0_23 = arith.constant 0 : index
    %40 = vector.load %arg1[%c0_22, %c0_23] : memref<16x16xf32, #tpu.memory_space<vmem>>, vector<16x16xf32>
    %c0_24 = arith.constant 0 : index
    %c16 = arith.constant 16 : index
    %41 = vector.load %arg17[%c0_24, %c16] : memref<32x32xf32, #tpu.memory_space<vmem>>, vector<16x16xf32>
    tpu.vector_store %arg17[%c0_24, %c16], %40 {strides = array<i32>} : memref<32x32xf32, #tpu.memory_space<vmem>>, vector<16x16xf32>,
    %c16_25 = arith.constant 16 : index
    %c0_26 = arith.constant 0 : index
    %42 = vector.load %arg17[%c16_25, %c0_26] : memref<32x32xf32, #tpu.memory_space<vmem>>, vector<16x32xf32>
    tpu.vector_store %arg17[%c16_25, %c0_26], %31 {strides = array<i32>} : memref<32x32xf32, #tpu.memory_space<vmem>>, vector<16x32xf32>,
    %c0_27 = arith.constant 0 : index
    %c0_28 = arith.constant 0 : index
    %43 = vector.load %arg17[%c0_27, %c0_28] : memref<32x32xf32, #tpu.memory_space<vmem>>, vector<32x32xf32>
    %44 = tpu.iota {dimensions = array<i32: 1>} : vector<1x32xi32>
    %c0_i32 = arith.constant 0 : i32
    %45 = vector.broadcast %c0_i32 : i32 to vector<1x32xi32>
    %46 = arith.cmpi sge, %44, %45 : vector<1x32xi32>
    %c16_i32 = arith.constant 16 : i32
    %47 = vector.broadcast %c16_i32 : i32 to vector<1x32xi32>
    %48 = arith.cmpi slt, %44, %47 : vector<1x32xi32>
    %49 = arith.andi %46, %48 : vector<1x32xi1>
    %50 = arith.extui %49 : vector<1x32xi1> to vector<1x32xi32>
    %51 = arith.sitofp %50 : vector<1x32xi32> to vector<1x32xf32>
    %c16_i32_29 = arith.constant 16 : i32
    %52 = vector.broadcast %c16_i32_29 : i32 to vector<1x32xi32>
    %53 = arith.cmpi sge, %44, %52 : vector<1x32xi32>
    %c32_i32 = arith.constant 32 : i32
    %54 = vector.broadcast %c32_i32 : i32 to vector<1x32xi32>
    %55 = arith.cmpi slt, %44, %54 : vector<1x32xi32>
    %56 = arith.andi %53, %55 : vector<1x32xi1>
    %57 = arith.extui %56 : vector<1x32xi1> to vector<1x32xi32>
    %58 = arith.sitofp %57 : vector<1x32xi32> to vector<1x32xf32>
    %cst_30 = arith.constant 2.500000e-01 : f32
    %59 = vector.broadcast %cst_30 : f32 to vector<1x32xf32>
    %60 = arith.mulf %51, %59 : vector<1x32xf32>
    %cst_31 = arith.constant 2.500000e-01 : f32
    %61 = vector.broadcast %cst_31 : f32 to vector<1x32xf32>
    %62 = arith.mulf %58, %61 : vector<1x32xf32>
    %63 = tpu.iota {dimensions = array<i32: 0>} : vector<64x32xi32>
    %64 = tpu.iota {dimensions = array<i32: 1>} : vector<64x32xi32>
    %c31_i32 = arith.constant 31 : i32
    %65 = vector.broadcast %c31_i32 : i32 to vector<64x32xi32>
    %66 = arith.andi %63, %65 : vector<64x32xi32>
    %c3_i32 = arith.constant 3 : i32
    %67 = vector.broadcast %c3_i32 : i32 to vector<64x32xi32>
    %68 = arith.shrsi %66, %67 : vector<64x32xi32>
    %c1_i32 = arith.constant 1 : i32
    %69 = vector.broadcast %c1_i32 : i32 to vector<64x32xi32>
    %70 = arith.andi %68, %69 : vector<64x32xi32>
    %c3_i32_32 = arith.constant 3 : i32
    %71 = vector.broadcast %c3_i32_32 : i32 to vector<64x32xi32>
    %72 = arith.shrsi %64, %71 : vector<64x32xi32>
    %c1_i32_33 = arith.constant 1 : i32
    %73 = vector.broadcast %c1_i32_33 : i32 to vector<64x32xi32>
    %74 = arith.andi %72, %73 : vector<64x32xi32>
    %75 = arith.cmpi eq, %70, %74 : vector<64x32xi32>
    %c7_i32 = arith.constant 7 : i32
    %76 = vector.broadcast %c7_i32 : i32 to vector<64x32xi32>
    %77 = arith.andi %64, %76 : vector<64x32xi32>
    %c4_i32 = arith.constant 4 : i32
    %78 = vector.broadcast %c4_i32 : i32 to vector<64x32xi32>
    %79 = arith.shrsi %64, %78 : vector<64x32xi32>
    %c3_i32_34 = arith.constant 3 : i32
    %80 = vector.broadcast %c3_i32_34 : i32 to vector<64x32xi32>
    %81 = arith.shli %79, %80 : vector<64x32xi32>
    %82 = arith.addi %77, %81 : vector<64x32xi32>
    %c7_i32_35 = arith.constant 7 : i32
    %83 = vector.broadcast %c7_i32_35 : i32 to vector<64x32xi32>
    %84 = arith.andi %66, %83 : vector<64x32xi32>
    %c4_i32_36 = arith.constant 4 : i32
    %85 = vector.broadcast %c4_i32_36 : i32 to vector<64x32xi32>
    %86 = arith.shrsi %66, %85 : vector<64x32xi32>
    %c3_i32_37 = arith.constant 3 : i32
    %87 = vector.broadcast %c3_i32_37 : i32 to vector<64x32xi32>
    %88 = arith.shli %86, %87 : vector<64x32xi32>
    %89 = arith.addi %84, %88 : vector<64x32xi32>
    %90 = arith.cmpi sle, %82, %89 : vector<64x32xi32>
    %91 = arith.andi %75, %90 : vector<64x32xi1>
    %cst_38 = arith.constant 0.000000e+00 : f32
    %cst_39 = arith.constant -1.000000e+30 : f32
    %92 = vector.broadcast %cst_38 : f32 to vector<64x32xf32>
    %93 = vector.broadcast %cst_39 : f32 to vector<64x32xf32>
    %94 = arith.select %91, %92, %93 : vector<64x32xi1>, vector<64x32xf32>
    %c0_40 = arith.constant 0 : index
    %c0_41 = arith.constant 0 : index
    %c0_42 = arith.constant 0 : index
    %95 = vector.load %arg12[%c0_40, %c0_41, %c0_42] : memref<2x1x32xf32, #tpu.memory_space<vmem>>, vector<1x1x32xf32>
    %96 = vector.shape_cast %95 : vector<1x1x32xf32> to vector<1x32xf32>
    %97 = arith.mulf %43, %43 : vector<32x32xf32>
    %cst_43 = arith.constant dense<0.000000e+00> : vector<32xf32>
    %98 = vector.multi_reduction <add>, %97, %cst_43 [1] : vector<32x32xf32> to vector<32xf32>
    %99 = vector.shape_cast %98 : vector<32xf32> to vector<32x1xf32>
    %cst_44 = arith.constant 3.200000e+01 : f32
    %100 = vector.broadcast %cst_44 : f32 to vector<32x1xf32>
    %101 = arith.divf %99, %100 : vector<32x1xf32>
    %cst_45 = arith.constant 9.99999997E-7 : f32
    %102 = vector.broadcast %cst_45 : f32 to vector<32x1xf32>
    %103 = arith.addf %101, %102 : vector<32x1xf32>
    %104 = math.rsqrt %103 : vector<32x1xf32>
    %105 = vector.broadcast %104 : vector<32x1xf32> to vector<32x32xf32>
    %106 = arith.mulf %43, %105 : vector<32x32xf32>
    %107 = vector.broadcast %96 : vector<1x32xf32> to vector<32x32xf32>
    %108 = arith.mulf %106, %107 : vector<32x32xf32>
    %c0_46 = arith.constant 0 : index
    %c0_47 = arith.constant 0 : index
    %c0_48 = arith.constant 0 : index
    %109 = vector.load %arg8[%c0_46, %c0_47, %c0_48] : memref<2x32x96xf32, #tpu.memory_space<vmem>>, vector<1x32x96xf32>
    %110 = vector.shape_cast %109 : vector<1x32x96xf32> to vector<32x96xf32>
    %cst_49 = arith.constant dense<0.000000e+00> : vector<32x96xf32>
    %111 = tpu.matmul %108, %110, %cst_49 {dimension_numbers = #tpu.dot_dimension_numbers<[1], [0], [0], [1], [0, 0, 1, 1], [], []>} : vector<32x32xf32>, vector<32x96xf32>, vector<32x96xf32> -> vector<32x96xf32>
    %112 = vector.extract_strided_slice %111 {offsets = [0, 0], sizes = [32, 32], strides = [1, 1]} : vector<32x96xf32> to vector<32x32xf32>
    %113 = vector.extract_strided_slice %111 {offsets = [0, 32], sizes = [32, 32], strides = [1, 1]} : vector<32x96xf32> to vector<32x32xf32>
    %114 = vector.extract_strided_slice %111 {offsets = [0, 64], sizes = [32, 32], strides = [1, 1]} : vector<32x96xf32> to vector<32x32xf32>
    %115 = vector.broadcast %60 : vector<1x32xf32> to vector<32x32xf32>
    %116 = arith.mulf %112, %115 : vector<32x32xf32>
    %c0_50 = arith.constant 0 : index
    %c0_51 = arith.constant 0 : index
    %117 = vector.load %arg18[%c0_50, %c0_51] : memref<64x32xf32, #tpu.memory_space<vmem>>, vector<32x32xf32>
    tpu.vector_store %arg18[%c0_50, %c0_51], %116 {strides = array<i32>} : memref<64x32xf32, #tpu.memory_space<vmem>>, vector<32x32xf32>,
    %118 = vector.broadcast %62 : vector<1x32xf32> to vector<32x32xf32>
    %119 = arith.mulf %112, %118 : vector<32x32xf32>
    %c32 = arith.constant 32 : index
    %c0_52 = arith.constant 0 : index
    %120 = vector.load %arg18[%c32, %c0_52] : memref<64x32xf32, #tpu.memory_space<vmem>>, vector<32x32xf32>
    tpu.vector_store %arg18[%c32, %c0_52], %119 {strides = array<i32>} : memref<64x32xf32, #tpu.memory_space<vmem>>, vector<32x32xf32>,
    %c0_53 = arith.constant 0 : index
    %c0_54 = arith.constant 0 : index
    %121 = vector.load %arg18[%c0_53, %c0_54] : memref<64x32xf32, #tpu.memory_space<vmem>>, vector<64x32xf32>
    %cst_55 = arith.constant dense<0.000000e+00> : vector<64x32xf32>
    %122 = tpu.matmul %121, %113, %cst_55 {dimension_numbers = #tpu.dot_dimension_numbers<[1], [1], [0], [0], [0, 0, 1, 0], [], []>} : vector<64x32xf32>, vector<32x32xf32>, vector<64x32xf32> -> vector<64x32xf32>
    %123 = arith.addf %122, %94 : vector<64x32xf32>
    %cst_56 = arith.constant dense<0xFF800000> : vector<64xf32>
    %124 = vector.multi_reduction <maximumf>, %123, %cst_56 [1] : vector<64x32xf32> to vector<64xf32>
    %125 = vector.shape_cast %124 : vector<64xf32> to vector<64x1xf32>
    %126 = vector.broadcast %125 : vector<64x1xf32> to vector<64x32xf32>
    %127 = arith.subf %123, %126 : vector<64x32xf32>
    %128 = math.exp %127 : vector<64x32xf32>
    %cst_57 = arith.constant dense<0.000000e+00> : vector<64xf32>
    %129 = vector.multi_reduction <add>, %128, %cst_57 [1] : vector<64x32xf32> to vector<64xf32>
    %130 = vector.shape_cast %129 : vector<64xf32> to vector<64x1xf32>
    %131 = tpu.reciprocal %130 {approx = true} : vector<64x1xf32> -> vector<64x1xf32>
    %132 = vector.broadcast %131 : vector<64x1xf32> to vector<64x32xf32>
    %133 = arith.mulf %128, %132 : vector<64x32xf32>
    %cst_58 = arith.constant dense<0.000000e+00> : vector<64x32xf32>
    %134 = tpu.matmul %133, %114, %cst_58 {dimension_numbers = #tpu.dot_dimension_numbers<[1], [0], [0], [1], [0, 0, 1, 1], [], []>} : vector<64x32xf32>, vector<32x32xf32>, vector<64x32xf32> -> vector<64x32xf32>
    %135 = vector.extract_strided_slice %134 {offsets = [0, 0], sizes = [32, 32], strides = [1, 1]} : vector<64x32xf32> to vector<32x32xf32>
    %136 = vector.broadcast %51 : vector<1x32xf32> to vector<32x32xf32>
    %137 = arith.mulf %135, %136 : vector<32x32xf32>
    %138 = vector.extract_strided_slice %134 {offsets = [32, 0], sizes = [32, 32], strides = [1, 1]} : vector<64x32xf32> to vector<32x32xf32>
    %139 = vector.broadcast %58 : vector<1x32xf32> to vector<32x32xf32>
    %140 = arith.mulf %138, %139 : vector<32x32xf32>
    %141 = arith.addf %137, %140 : vector<32x32xf32>
    %c0_59 = arith.constant 0 : index
    %c0_60 = arith.constant 0 : index
    %c0_61 = arith.constant 0 : index
    %142 = vector.load %arg9[%c0_59, %c0_60, %c0_61] : memref<2x32x32xf32, #tpu.memory_space<vmem>>, vector<1x32x32xf32>
    %143 = vector.shape_cast %142 : vector<1x32x32xf32> to vector<32x32xf32>
    %cst_62 = arith.constant dense<0.000000e+00> : vector<32x32xf32>
    %144 = tpu.matmul %141, %143, %cst_62 {dimension_numbers = #tpu.dot_dimension_numbers<[1], [0], [0], [1], [0, 0, 1, 1], [], []>} : vector<32x32xf32>, vector<32x32xf32>, vector<32x32xf32> -> vector<32x32xf32>
    %145 = arith.addf %43, %144 : vector<32x32xf32>
    %c0_63 = arith.constant 0 : index
    %c0_64 = arith.constant 0 : index
    %c0_65 = arith.constant 0 : index
    %146 = vector.load %arg13[%c0_63, %c0_64, %c0_65] : memref<2x1x32xf32, #tpu.memory_space<vmem>>, vector<1x1x32xf32>
    %147 = vector.shape_cast %146 : vector<1x1x32xf32> to vector<1x32xf32>
    %148 = arith.mulf %145, %145 : vector<32x32xf32>
    %cst_66 = arith.constant dense<0.000000e+00> : vector<32xf32>
    %149 = vector.multi_reduction <add>, %148, %cst_66 [1] : vector<32x32xf32> to vector<32xf32>
    %150 = vector.shape_cast %149 : vector<32xf32> to vector<32x1xf32>
    %cst_67 = arith.constant 3.200000e+01 : f32
    %151 = vector.broadcast %cst_67 : f32 to vector<32x1xf32>
    %152 = arith.divf %150, %151 : vector<32x1xf32>
    %cst_68 = arith.constant 9.99999997E-7 : f32
    %153 = vector.broadcast %cst_68 : f32 to vector<32x1xf32>
    %154 = arith.addf %152, %153 : vector<32x1xf32>
    %155 = math.rsqrt %154 : vector<32x1xf32>
    %156 = vector.broadcast %155 : vector<32x1xf32> to vector<32x32xf32>
    %157 = arith.mulf %145, %156 : vector<32x32xf32>
    %158 = vector.broadcast %147 : vector<1x32xf32> to vector<32x32xf32>
    %159 = arith.mulf %157, %158 : vector<32x32xf32>
    %c0_69 = arith.constant 0 : index
    %c0_70 = arith.constant 0 : index
    %c0_71 = arith.constant 0 : index
    %160 = vector.load %arg10[%c0_69, %c0_70, %c0_71] : memref<2x32x64xf32, #tpu.memory_space<vmem>>, vector<1x32x64xf32>
    %161 = vector.shape_cast %160 : vector<1x32x64xf32> to vector<32x64xf32>
    %cst_72 = arith.constant dense<0.000000e+00> : vector<32x64xf32>
    %162 = tpu.matmul %159, %161, %cst_72 {dimension_numbers = #tpu.dot_dimension_numbers<[1], [0], [0], [1], [0, 0, 1, 1], [], []>} : vector<32x32xf32>, vector<32x64xf32>, vector<32x64xf32> -> vector<32x64xf32>
    %163 = arith.negf %162 : vector<32x64xf32>
    %164 = math.exp %163 : vector<32x64xf32>
    %cst_73 = arith.constant 1.000000e+00 : f32
    %165 = vector.broadcast %cst_73 : f32 to vector<32x64xf32>
    %166 = arith.addf %165, %164 : vector<32x64xf32>
    %167 = arith.divf %165, %166 : vector<32x64xf32>
    %168 = arith.mulf %162, %167 : vector<32x64xf32>
    %c0_74 = arith.constant 0 : index
    %c0_75 = arith.constant 0 : index
    %c0_76 = arith.constant 0 : index
    %169 = vector.load %arg11[%c0_74, %c0_75, %c0_76] : memref<2x64x32xf32, #tpu.memory_space<vmem>>, vector<1x64x32xf32>
    %170 = vector.shape_cast %169 : vector<1x64x32xf32> to vector<64x32xf32>
    %cst_77 = arith.constant dense<0.000000e+00> : vector<32x32xf32>
    %171 = tpu.matmul %168, %170, %cst_77 {dimension_numbers = #tpu.dot_dimension_numbers<[1], [0], [0], [1], [0, 0, 1, 1], [], []>} : vector<32x64xf32>, vector<64x32xf32>, vector<32x32xf32> -> vector<32x32xf32>
    %172 = arith.addf %145, %171 : vector<32x32xf32>
    %c1 = arith.constant 1 : index
    %c0_78 = arith.constant 0 : index
    %c0_79 = arith.constant 0 : index
    %173 = vector.load %arg12[%c1, %c0_78, %c0_79] : memref<2x1x32xf32, #tpu.memory_space<vmem>>, vector<1x1x32xf32>
    %174 = vector.shape_cast %173 : vector<1x1x32xf32> to vector<1x32xf32>
    %175 = arith.mulf %172, %172 : vector<32x32xf32>
    %cst_80 = arith.constant dense<0.000000e+00> : vector<32xf32>
    %176 = vector.multi_reduction <add>, %175, %cst_80 [1] : vector<32x32xf32> to vector<32xf32>
    %177 = vector.shape_cast %176 : vector<32xf32> to vector<32x1xf32>
    %cst_81 = arith.constant 3.200000e+01 : f32
    %178 = vector.broadcast %cst_81 : f32 to vector<32x1xf32>
    %179 = arith.divf %177, %178 : vector<32x1xf32>
    %cst_82 = arith.constant 9.99999997E-7 : f32
    %180 = vector.broadcast %cst_82 : f32 to vector<32x1xf32>
    %181 = arith.addf %179, %180 : vector<32x1xf32>
    %182 = math.rsqrt %181 : vector<32x1xf32>
    %183 = vector.broadcast %182 : vector<32x1xf32> to vector<32x32xf32>
    %184 = arith.mulf %172, %183 : vector<32x32xf32>
    %185 = vector.broadcast %174 : vector<1x32xf32> to vector<32x32xf32>
    %186 = arith.mulf %184, %185 : vector<32x32xf32>
    %c1_83 = arith.constant 1 : index
    %c0_84 = arith.constant 0 : index
    %c0_85 = arith.constant 0 : index
    %187 = vector.load %arg8[%c1_83, %c0_84, %c0_85] : memref<2x32x96xf32, #tpu.memory_space<vmem>>, vector<1x32x96xf32>
    %188 = vector.shape_cast %187 : vector<1x32x96xf32> to vector<32x96xf32>
    %cst_86 = arith.constant dense<0.000000e+00> : vector<32x96xf32>
    %189 = tpu.matmul %186, %188, %cst_86 {dimension_numbers = #tpu.dot_dimension_numbers<[1], [0], [0], [1], [0, 0, 1, 1], [], []>} : vector<32x32xf32>, vector<32x96xf32>, vector<32x96xf32> -> vector<32x96xf32>
    %190 = vector.extract_strided_slice %189 {offsets = [0, 0], sizes = [32, 32], strides = [1, 1]} : vector<32x96xf32> to vector<32x32xf32>
    %191 = vector.extract_strided_slice %189 {offsets = [0, 32], sizes = [32, 32], strides = [1, 1]} : vector<32x96xf32> to vector<32x32xf32>
    %192 = vector.extract_strided_slice %189 {offsets = [0, 64], sizes = [32, 32], strides = [1, 1]} : vector<32x96xf32> to vector<32x32xf32>
    %193 = vector.broadcast %60 : vector<1x32xf32> to vector<32x32xf32>
    %194 = arith.mulf %190, %193 : vector<32x32xf32>
    %c0_87 = arith.constant 0 : index
    %c0_88 = arith.constant 0 : index
    %195 = vector.load %arg18[%c0_87, %c0_88] : memref<64x32xf32, #tpu.memory_space<vmem>>, vector<32x32xf32>
    tpu.vector_store %arg18[%c0_87, %c0_88], %194 {strides = array<i32>} : memref<64x32xf32, #tpu.memory_space<vmem>>, vector<32x32xf32>,
    %196 = vector.broadcast %62 : vector<1x32xf32> to vector<32x32xf32>
    %197 = arith.mulf %190, %196 : vector<32x32xf32>
    %c32_89 = arith.constant 32 : index
    %c0_90 = arith.constant 0 : index
    %198 = vector.load %arg18[%c32_89, %c0_90] : memref<64x32xf32, #tpu.memory_space<vmem>>, vector<32x32xf32>
    tpu.vector_store %arg18[%c32_89, %c0_90], %197 {strides = array<i32>} : memref<64x32xf32, #tpu.memory_space<vmem>>, vector<32x32xf32>,
    %c0_91 = arith.constant 0 : index
    %c0_92 = arith.constant 0 : index
    %199 = vector.load %arg18[%c0_91, %c0_92] : memref<64x32xf32, #tpu.memory_space<vmem>>, vector<64x32xf32>
    %cst_93 = arith.constant dense<0.000000e+00> : vector<64x32xf32>
    %200 = tpu.matmul %199, %191, %cst_93 {dimension_numbers = #tpu.dot_dimension_numbers<[1], [1], [0], [0], [0, 0, 1, 0], [], []>} : vector<64x32xf32>, vector<32x32xf32>, vector<64x32xf32> -> vector<64x32xf32>
    %201 = arith.addf %200, %94 : vector<64x32xf32>
    %cst_94 = arith.constant dense<0xFF800000> : vector<64xf32>
    %202 = vector.multi_reduction <maximumf>, %201, %cst_94 [1] : vector<64x32xf32> to vector<64xf32>
    %203 = vector.shape_cast %202 : vector<64xf32> to vector<64x1xf32>
    %204 = vector.broadcast %203 : vector<64x1xf32> to vector<64x32xf32>
    %205 = arith.subf %201, %204 : vector<64x32xf32>
    %206 = math.exp %205 : vector<64x32xf32>
    %cst_95 = arith.constant dense<0.000000e+00> : vector<64xf32>
    %207 = vector.multi_reduction <add>, %206, %cst_95 [1] : vector<64x32xf32> to vector<64xf32>
    %208 = vector.shape_cast %207 : vector<64xf32> to vector<64x1xf32>
    %209 = tpu.reciprocal %208 {approx = true} : vector<64x1xf32> -> vector<64x1xf32>
    %210 = vector.broadcast %209 : vector<64x1xf32> to vector<64x32xf32>
    %211 = arith.mulf %206, %210 : vector<64x32xf32>
    %cst_96 = arith.constant dense<0.000000e+00> : vector<64x32xf32>
    %212 = tpu.matmul %211, %192, %cst_96 {dimension_numbers = #tpu.dot_dimension_numbers<[1], [0], [0], [1], [0, 0, 1, 1], [], []>} : vector<64x32xf32>, vector<32x32xf32>, vector<64x32xf32> -> vector<64x32xf32>
    %213 = vector.extract_strided_slice %212 {offsets = [0, 0], sizes = [32, 32], strides = [1, 1]} : vector<64x32xf32> to vector<32x32xf32>
    %214 = vector.broadcast %51 : vector<1x32xf32> to vector<32x32xf32>
    %215 = arith.mulf %213, %214 : vector<32x32xf32>
    %216 = vector.extract_strided_slice %212 {offsets = [32, 0], sizes = [32, 32], strides = [1, 1]} : vector<64x32xf32> to vector<32x32xf32>
    %217 = vector.broadcast %58 : vector<1x32xf32> to vector<32x32xf32>
    %218 = arith.mulf %216, %217 : vector<32x32xf32>
    %219 = arith.addf %215, %218 : vector<32x32xf32>
    %c1_97 = arith.constant 1 : index
    %c0_98 = arith.constant 0 : index
    %c0_99 = arith.constant 0 : index
    %220 = vector.load %arg9[%c1_97, %c0_98, %c0_99] : memref<2x32x32xf32, #tpu.memory_space<vmem>>, vector<1x32x32xf32>
    %221 = vector.shape_cast %220 : vector<1x32x32xf32> to vector<32x32xf32>
    %cst_100 = arith.constant dense<0.000000e+00> : vector<32x32xf32>
    %222 = tpu.matmul %219, %221, %cst_100 {dimension_numbers = #tpu.dot_dimension_numbers<[1], [0], [0], [1], [0, 0, 1, 1], [], []>} : vector<32x32xf32>, vector<32x32xf32>, vector<32x32xf32> -> vector<32x32xf32>
    %223 = arith.addf %172, %222 : vector<32x32xf32>
    %c1_101 = arith.constant 1 : index
    %c0_102 = arith.constant 0 : index
    %c0_103 = arith.constant 0 : index
    %224 = vector.load %arg13[%c1_101, %c0_102, %c0_103] : memref<2x1x32xf32, #tpu.memory_space<vmem>>, vector<1x1x32xf32>
    %225 = vector.shape_cast %224 : vector<1x1x32xf32> to vector<1x32xf32>
    %226 = arith.mulf %223, %223 : vector<32x32xf32>
    %cst_104 = arith.constant dense<0.000000e+00> : vector<32xf32>
    %227 = vector.multi_reduction <add>, %226, %cst_104 [1] : vector<32x32xf32> to vector<32xf32>
    %228 = vector.shape_cast %227 : vector<32xf32> to vector<32x1xf32>
    %cst_105 = arith.constant 3.200000e+01 : f32
    %229 = vector.broadcast %cst_105 : f32 to vector<32x1xf32>
    %230 = arith.divf %228, %229 : vector<32x1xf32>
    %cst_106 = arith.constant 9.99999997E-7 : f32
    %231 = vector.broadcast %cst_106 : f32 to vector<32x1xf32>
    %232 = arith.addf %230, %231 : vector<32x1xf32>
    %233 = math.rsqrt %232 : vector<32x1xf32>
    %234 = vector.broadcast %233 : vector<32x1xf32> to vector<32x32xf32>
    %235 = arith.mulf %223, %234 : vector<32x32xf32>
    %236 = vector.broadcast %225 : vector<1x32xf32> to vector<32x32xf32>
    %237 = arith.mulf %235, %236 : vector<32x32xf32>
    %c1_107 = arith.constant 1 : index
    %c0_108 = arith.constant 0 : index
    %c0_109 = arith.constant 0 : index
    %238 = vector.load %arg10[%c1_107, %c0_108, %c0_109] : memref<2x32x64xf32, #tpu.memory_space<vmem>>, vector<1x32x64xf32>
    %239 = vector.shape_cast %238 : vector<1x32x64xf32> to vector<32x64xf32>
    %cst_110 = arith.constant dense<0.000000e+00> : vector<32x64xf32>
    %240 = tpu.matmul %237, %239, %cst_110 {dimension_numbers = #tpu.dot_dimension_numbers<[1], [0], [0], [1], [0, 0, 1, 1], [], []>} : vector<32x32xf32>, vector<32x64xf32>, vector<32x64xf32> -> vector<32x64xf32>
    %241 = arith.negf %240 : vector<32x64xf32>
    %242 = math.exp %241 : vector<32x64xf32>
    %cst_111 = arith.constant 1.000000e+00 : f32
    %243 = vector.broadcast %cst_111 : f32 to vector<32x64xf32>
    %244 = arith.addf %243, %242 : vector<32x64xf32>
    %245 = arith.divf %243, %244 : vector<32x64xf32>
    %246 = arith.mulf %240, %245 : vector<32x64xf32>
    %c1_112 = arith.constant 1 : index
    %c0_113 = arith.constant 0 : index
    %c0_114 = arith.constant 0 : index
    %247 = vector.load %arg11[%c1_112, %c0_113, %c0_114] : memref<2x64x32xf32, #tpu.memory_space<vmem>>, vector<1x64x32xf32>
    %248 = vector.shape_cast %247 : vector<1x64x32xf32> to vector<64x32xf32>
    %cst_115 = arith.constant dense<0.000000e+00> : vector<32x32xf32>
    %249 = tpu.matmul %246, %248, %cst_115 {dimension_numbers = #tpu.dot_dimension_numbers<[1], [0], [0], [1], [0, 0, 1, 1], [], []>} : vector<32x64xf32>, vector<64x32xf32>, vector<32x32xf32> -> vector<32x32xf32>
    %250 = arith.addf %223, %249 : vector<32x32xf32>
    %251 = vector.extract_strided_slice %250 {offsets = [16, 0], sizes = [16, 32], strides = [1, 1]} : vector<32x32xf32> to vector<16x32xf32>
    %c0_116 = arith.constant 0 : index
    %c0_117 = arith.constant 0 : index
    %252 = vector.load %arg14[%c0_116, %c0_117] : memref<1x32xf32, #tpu.memory_space<vmem>>, vector<1x32xf32>
    %253 = arith.mulf %251, %251 : vector<16x32xf32>
    %cst_118 = arith.constant dense<0.000000e+00> : vector<16xf32>
    %254 = vector.multi_reduction <add>, %253, %cst_118 [1] : vector<16x32xf32> to vector<16xf32>
    %255 = vector.shape_cast %254 : vector<16xf32> to vector<16x1xf32>
    %cst_119 = arith.constant 3.200000e+01 : f32
    %256 = vector.broadcast %cst_119 : f32 to vector<16x1xf32>
    %257 = arith.divf %255, %256 : vector<16x1xf32>
    %cst_120 = arith.constant 9.99999997E-7 : f32
    %258 = vector.broadcast %cst_120 : f32 to vector<16x1xf32>
    %259 = arith.addf %257, %258 : vector<16x1xf32>
    %260 = math.rsqrt %259 : vector<16x1xf32>
    %261 = vector.broadcast %260 : vector<16x1xf32> to vector<16x32xf32>
    %262 = arith.mulf %251, %261 : vector<16x32xf32>
    %263 = vector.broadcast %252 : vector<1x32xf32> to vector<16x32xf32>
    %264 = arith.mulf %262, %263 : vector<16x32xf32>
    %c0_121 = arith.constant 0 : index
    %c0_122 = arith.constant 0 : index
    %265 = vector.load %arg15[%c0_121, %c0_122] : memref<32x128xf32, #tpu.memory_space<vmem>>, vector<32x128xf32>
    %cst_123 = arith.constant dense<0.000000e+00> : vector<16x128xf32>
    %266 = tpu.matmul %264, %265, %cst_123 {dimension_numbers = #tpu.dot_dimension_numbers<[1], [0], [0], [1], [0, 0, 1, 1], [], []>} : vector<16x32xf32>, vector<32x128xf32>, vector<16x128xf32> -> vector<16x128xf32>
    %c0_124 = arith.constant 0 : index
    %c0_125 = arith.constant 0 : index
    %267 = vector.load %arg16[%c0_124, %c0_125] : memref<16x128xf32, #tpu.memory_space<vmem>>, vector<16x128xf32>
    tpu.vector_store %arg16[%c0_124, %c0_125], %266 {strides = array<i32>} : memref<16x128xf32, #tpu.memory_space<vmem>>, vector<16x128xf32>,
    return
  }
}

</mosaic_0001>

<bundles_post_ra>
// kernel: chords_generator_forward.1
= control target key start
LH: loop header
LB: loop body
LE: loop exit
PB: predicated region body
PF: predicated region fallthrough
CT: control target
= control target key end

     0   :  { %s4253_s0 = inlined_call_operand.vmem [shape: f32[2,16], index: 0, kind: input, shape index: {}]   ;;  %s4254_s1 = inlined_call_operand.hbm [shape: f32[16,16], index: 1, kind: input, shape index: {}]   ;;  %s4255_s2 = inlined_call_operand.vmem [shape: s32[16,1], index: 2, kind: input, shape index: {}]   ;;  %s4256_s3 = inlined_call_operand.hbm [shape: f32[16,32], index: 3, kind: input, shape index: {}]   ;;  %s4257_s4 = inlined_call_operand.vmem [shape: f32[1,32], index: 4, kind: input, shape index: {}]   ;;  %s4258_s5 = inlined_call_operand.vmem [shape: f32[32,16], index: 5, kind: input, shape index: {}]   ;;  %s4259_s6 = inlined_call_operand.vmem [shape: f32[1,16], index: 6, kind: input, shape index: {}]   ;;  %s4260_s7 = inlined_call_operand.vmem [shape: f32[32,32], index: 7, kind: input, shape index: {}]   ;;  %s4261_s8 = inlined_call_operand.vmem [shape: f32[2,32,96], index: 8, kind: input, shape index: {}]   ;;  %s4262_s9 = inlined_call_operand.vmem [shape: f32[2,32,32], index: 9, kind: input, shape index: {}]   ;;  %s4263_s10 = inlined_call_operand.vmem [shape: f32[2,32,64], index: 10, kind: input, shape index: {}]   ;;  %s4264_s11 = inlined_call_operand.vmem [shape: f32[2,64,32], index: 11, kind: input, shape index: {}]   ;;  %s4265_s12 = inlined_call_operand.vmem [shape: f32[2,1,32], index: 12, kind: input, shape index: {}]   ;;  %s4266_s13 = inlined_call_operand.vmem [shape: f32[2,1,32], index: 13, kind: input, shape index: {}]   ;;  %s4267_s14 = inlined_call_operand.vmem [shape: f32[1,32], index: 14, kind: input, shape index: {}]   ;;  %s4268_s15 = inlined_call_operand.hbm [shape: f32[32,128], index: 15, kind: input, shape index: {}]   ;;  %s4269_s16 = inlined_call_operand.hbm [shape: f32[16,128], index: 16, kind: output, shape index: {}]  }
   0x1   :  { %4270 = sst [smem:[#allocation14_spill]] %s4253_s0 }
   0x2   :  { %21 = vsyncpa [#allocation5], 0 }
   0x3   :  { %22 = vsyncpa [#allocation8], 0 }
   0x4   :  { %23 = vsyncpa [#allocation6], 0  ;;  %s3475_s21 = smov [#allocation7]   ;;  %s3476_s23 = smov [#allocation4]  }
   0x5   :  { %s45_s22 = sshll.u32 %s3475_s21, 4  ;;  %s31_s24 = sshll.u32 %s3476_s23, 4  ;;  %s46_s22 = int_to_ptr.vmem [resolvable:$true] %s45_s22  ;;  %s3574_s24 = int_to_ptr.vmem [resolvable:$true] %s31_s24 }
   0x6   :  { %s3381_s27 = scalar_lea.hbm %s4256_s3, 256 }
   0x7   :  { %p3382_p0 = scmp.ne.s32.totalorder %s4256_s3, %s3381_s27  ;;  %p3385_p1 = scmp.lt.u32.totalorder %s3381_s27, %s4256_s3 }
   0x9   :  { %p3387_p2 = pnand %p3385_p1, %p3382_p0 }
   0xb   :  { %3390 = shalt.err (!%p3387_p2)
}
   0xc   :  { %s3391_s17 = scalar_lea.vmem %s46_s22, 256  ;;  %p3396_p4 = scmp.lt.s32.totalorder %s46_s22, %s46_s22 }
   0xd   :  { %p3392_p3 = scmp.ne.s32.totalorder %s46_s22, %s3391_s17  ;;  %p3397_p5 = scmp.lt.s32.totalorder %s3391_s17, %s3391_s17 }
   0xf   :  { %p3398_p6 = por %p3397_p5, %p3396_p4 }
  0x11   :  { %p3399_p7 = pnand %p3398_p6, %p3392_p3 }
  0x13   :  { %3402 = shalt.err (!%p3399_p7)
}
  0x14   :  { %s3477_s18 = smov 128   ;;  %s3478_s19 = smov 8  }
  0x15   :  { %51 = dma.hbm_to_vmem [thread:$0]  %s4256_s3, 256, %s46_s22, [#allocation8], %s3477_s18, %s3477_s18, %s3478_s19  }
  0x16   :  { %s3403_s26 = scalar_lea.hbm %s4254_s1, 256 }
  0x17   :  { %p3404_p8 = scmp.ne.s32.totalorder %s4254_s1, %s3403_s26  ;;  %p3407_p9 = scmp.lt.u32.totalorder %s3403_s26, %s4254_s1 }
  0x19   :  { %p3409_p10 = pnand %p3407_p9, %p3404_p8 }
  0x1b   :  { %3412 = shalt.err (!%p3409_p10)
}
  0x1c   :  { %s3413_s0 = scalar_lea.vmem %s3574_s24, 256  ;;  %p3418_p12 = scmp.lt.s32.totalorder %s3574_s24, %s3574_s24 }
  0x1d   :  { %p3414_p11 = scmp.ne.s32.totalorder %s3574_s24, %s3413_s0  ;;  %p3419_p13 = scmp.lt.s32.totalorder %s3413_s0, %s3413_s0 }
  0x1f   :  { %p3420_p0 = por %p3419_p13, %p3418_p12 }
  0x21   :  { %p3421_p1 = pnand %p3420_p0, %p3414_p11 }
  0x23   :  { %3424 = shalt.err (!%p3421_p1)
}
  0x24   :  { %37 = dma.hbm_to_vmem [thread:$0]  %s4254_s1, 256, %s3574_s24, [#allocation5], %s3477_s18, %s3477_s18, %s3478_s19  }
  0x25   :  { %s3479_s17 = smov [#allocation9]   ;;  %s3425_s25 = scalar_lea.hbm %s4268_s15, 512 }
  0x26   :  { %s79_s20 = sshll.u32 %s3479_s17, 4  ;;  %p3426_p2 = scmp.ne.s32.totalorder %s4268_s15, %s3425_s25  ;;  %s80_s20 = int_to_ptr.vmem [resolvable:$true] %s79_s20 }
  0x27   :  { %p3429_p3 = scmp.lt.u32.totalorder %s3425_s25, %s4268_s15 }
  0x29   :  { %p3431_p4 = pnand %p3429_p3, %p3426_p2 }
  0x2b   :  { %3434 = shalt.err (!%p3431_p4)
}
  0x2c   :  { %s3435_s30 = scalar_lea.vmem %s80_s20, 512  ;;  %p3440_p6 = scmp.lt.s32.totalorder %s80_s20, %s80_s20 }
  0x2d   :  { %p3436_p5 = scmp.ne.s32.totalorder %s80_s20, %s3435_s30  ;;  %p3441_p7 = scmp.lt.s32.totalorder %s3435_s30, %s3435_s30 }
  0x2f   :  { %p3442_p8 = por %p3441_p7, %p3440_p6 }
  0x31   :  { %p3443_p9 = pnand %p3442_p8, %p3436_p5 }
  0x33   :  { %3446 = shalt.err (!%p3443_p9)
}
  0x34   :  { %85 = dma.hbm_to_vmem [thread:$0]  %s4268_s15, 512, %s80_s20, [#allocation8], %s3477_s18, %s3477_s18, %s3478_s19  }
  0x35   :  { %3469 = dma.done.wait [#allocation5], 256  }
  0x36   :  { %3470 = vsyncadd [#allocation5], 4294967040 }
  0x37   :  { %3471 = dma.done.wait [#allocation8], 768  }
  0x38   :  { %3472 = vsyncadd [#allocation8], 4294966528  ;;  %v3480_v0 = vmov 0.0|0.0   ;;  %vm3481_vm0 = vmmov 0   ;;  %v3482_v1 = vmov 0.0   ;;  %v3483_v2 = vmov 0  }
  0x39   :  { %3047 = vmatprep.subr.bf16.mxu0 %v3480_v0  ;;  %2803 = vmatprep.mubr.msk.f32.mxu0 %vm3481_vm0, %v3482_v1  ;;  %v96_v3 = vld [vmem:[#allocation7] sm:$0xff]  ;;  %v97_v4 = vld [vmem:[#allocation7 + $0x8] sm:$0xff]  ;;  %v273_v6 = vld [vmem:[%s4255_s2] sm:$0xff]  ;;  %s4271_s17 = sld [smem:[#allocation14_spill]]  ;;  %vm105_vm1 = vcmask 130048   ;;  %v275_v23 = vlaneseq  ;;  %vm199_vm3 = vcmask 261120  }
  0x3a   :  { %3206 = vset.pattern.permute.xlu0 %v3483_v2  ;;  %3050 = vmatprep.subr.bf16.mxu1 %v3480_v0  ;;  %v3048_v5 = vpack.c.bf16 %v97_v4, %v96_v3  ;;  %v274_v8 = vld [vmem:[%s4255_s2 + $0x8] sm:$0xff]  ;;  %v188_v9 = vld [vmem:[%s4258_s5] sm:$0xff]  ;;  %v190_v14 = vld [vmem:[%s4258_s5 + $0x10] sm:$0xff]  ;;  %vm394_vm5 = vcmask 261248   ;;  %s3485_s0 = smov 96   ;;  %s3487_s15 = smov 64  }
  0x3b   :  { %2814 = vmatprep.mubr.msk.f32.mxu1 %vm3481_vm0, %v3482_v1  ;;  %278 = vperm.xlu0 %3206, %v273_v6   ;;  %v189_v10 = vld [vmem:[%s4258_s5 + $0x8] sm:$0xff]  ;;  %v289_v11 = vld [vmem:[%s4260_s7] sm:$0xff]  ;;  %v191_v15 = vld [vmem:[%s4258_s5 + $0x18] sm:$0xff]  ;;  %s3484_s5 = smov 16   ;;  %v3662_v24 = vand.u32 127, %v275_v23  ;;  %v3676_v44 = vshrl.u32 %v275_v23, 7 }
  0x3c   :  { %3049 = vmatpush3.bf16.msra.mxu0 %v3048_v5  ;;  %v3051_v12 = vpack.c.bf16 %v189_v10, %v188_v9  ;;  %v290_v13 = vld [vmem:[%s4260_s7 + $0x8] sm:$0xff]  ;;  %v3054_v17 = vpack.c.bf16 %v191_v15, %v190_v14  ;;  %v291_v18 = vld [vmem:[%s4260_s7 + $0x10] sm:$0xff]  ;;  %v292_v19 = vld [vmem:[%s4260_s7 + $0x18] sm:$0xff]  ;;  %s3488_s25 = smov [#allocation10]  }
  0x3d   :  { %v3056_v16 = vpack.c.bf16 %v290_v13, %v289_v11  ;;  %v3060_v20 = vpack.c.bf16 %v292_v19, %v291_v18  ;;  %v384_v21 = vld [vmem:[#allocation4] sm:$0xff]  ;;  %v385_v22 = vld [vmem:[#allocation4 + $0x8] sm:$0xff]  ;;  %v376_v47 = vsub.s32 0, %v3676_v44  ;;  %v381_v48 = vsub.s32 1, %v3676_v44  ;;  %vm3770_vm10 = vmpackc.low %vm199_vm3, %vm199_vm3  ;;  %s2527_s26 = sshll.u32 %s3488_s25, 4  ;;  %s2528_s26 = int_to_ptr.vmem [resolvable:$true] %s2527_s26 }
  0x3e   :  { %3052 = vmatpush3.bf16.msra.mxu1 %v3051_v12  ;;  %388 = vrot.lane.b32.xlu1 %v384_v21, %s3484_s5  ;;  %v2540_v29 = vld [vmem:[%s4257_s4] ss:$0 sm:$0xff]  ;;  %v563_v5 = vld [vmem:[%s4261_s8 + $0x8] sm:$0xff]  ;;  %vm408_vm6 = vcmp.ge.s32.totalorder %v3662_v24, 16  ;;  %vm409_vm7 = vcmp.lt.s32.totalorder %v3662_v24, 32  ;;  %vm404_vm8 = vcmp.lt.s32.totalorder %v3662_v24, 16  ;;  %p3452_p11 = scmp.lt.s32.totalorder %s2528_s26, %s2528_s26 }
  0x3f   :  { %v95_v7 = vld [vmem:[%s4271_s17] sm:$0x3]  ;;  %281 = vperm.xlu0 %3206, %v274_v8   ;;  %3053 = vmatprep.subr.bf16.mxu1 %v3480_v0  ;;  %v565_v8 = vld [vmem:[%s4261_s8 + $0x18] sm:$0xff]  ;;  %vm410_vm9 = vmand %vm408_vm6, %vm409_vm7  ;;  %s3447_s27 = scalar_lea.vmem %s2528_s26, 256 }
  0x40   :  { %2804 = vmatmul.mubr.msk.f32.vlgmr.msra.gmra.mrb[0].mxu0 %vm105_vm1, %v95_v7  ;;  %3057 = vmatprep.subr.bf16.mxu0 %v3056_v16  ;;  %v2542_v46 = vld [vmem:[%s4259_s6] ss:$0 sm:$0xff]  ;;  %v564_v7 = vld [vmem:[%s4261_s8 + $0x10] sm:$0xff]  ;;  %p3448_p10 = scmp.ne.s32.totalorder %s2528_s26, %s3447_s27  ;;  %p3453_p12 = scmp.lt.s32.totalorder %s3447_s27, %s3447_s27 }
  0x41   :  { %3059 = vmatpush3.bf16.msra.mxu0 %v3056_v16  ;;  %v562_v4 = vld [vmem:[%s4261_s8] sm:$0xff]  ;;  %v3068_v9 = vpack.c.bf16 %v565_v8, %v564_v7 }
  0x42   :  { %3055 = vmatpush3.bf16.msra.mxu1 %v3054_v17  ;;  %3061 = vmatprep.subr.bf16.mxu0 %v3060_v20  ;;  %v3064_v6 = vpack.c.bf16 %v563_v5, %v562_v4  ;;  %v2550_v23 = vld [vmem:[%s4265_s12] ss:$0 sm:$0xff]  ;;  %p3454_p13 = por %p3453_p12, %p3452_p11 }
  0x43   :  { %390 = vrot.lane.b32.xlu1 %v385_v22, %s3484_s5 }
  0x44   :  { %3065 = vmatprep.subr.bf16.mxu1 %v3064_v6  ;;  %p3455_p0 = pnand %p3454_p13, %p3448_p10 }
  0x45   :  { %3063 = vmatpush3.bf16.msra.mxu0 %v3060_v20 }
  0xb0   :  { %v389_v45 = vpop.permute.xlu1 %388 }
  0xb5   :  { %v391_v54 = vpop.permute.xlu1 %390 }
  0xba   :  { %v279_v25 = vpop.permute.xlu0 %278 }
  0xbb   :  { %vm283_vm2 = vcmp.eq.s32.totalorder %v279_v25, %v3662_v24 }
  0xbc   :  { %v2544_v26 = vsel %vm283_vm2, 1.0, %v3482_v1 }
  0xbd   :  { %2825 = vmatprep.mubr.msk.f32.mxu0 %vm199_vm3, %v2544_v26 }
  0xbe   :  { %v282_v27 = vpop.permute.xlu0 %281 }
  0xbf   :  { %vm284_vm4 = vcmp.eq.s32.totalorder %v282_v27, %v3662_v24 }
  0xc0   :  { %v2545_v28 = vsel %vm284_vm4, 1.0, %v3482_v1 }
  0xc1   :  { %2826 = vmatmul.mubr.msk.f32.vlgmr.msra.gmra.mrb[2].mxu0 %vm199_vm3, %v2545_v28 }
 0x113   :  { %v175_v30 = vpop.f32.mrb[0].mxu0 }
 0x114   :  { %v176_v31 = vadd.f32 %v2540_v29, %v175_v30  ;;  %v2805_v32 = vpop.f32.mrb[1].mxu0 }
 0x116   :  { %v179_v33 = vmul.f32 %v176_v31, %v176_v31 }
 0x118   :  { %v180_v34 = vmul.f32 %v179_v33, %v176_v31 }
 0x11a   :  { %v181_v35 = vmul.f32 0.044715, %v180_v34 }
 0x11c   :  { %v182_v36 = vadd.f32 %v181_v35, %v176_v31 }
 0x11e   :  { %v183_v37 = vmul.f32 0.7978846, %v182_v36  ;;  %v3732_v36 = vsel %vm404_vm8, 1.0, %v3482_v1 }
 0x120   :  { %3247 = vtanh.f32 %v183_v37  ;;  %v3735_v37 = vsel %vm410_vm9, 1.0, %v3482_v1 }
 0x12a   :  { %v3248_v38 = vpop.eup %3247 }
 0x12b   :  { %v185_v39 = vadd.f32 1.0, %v3248_v38  ;;  %v3738_v38 = vmul.f32 0.25, %v3732_v36 }
 0x12d   :  { %v186_v40 = vmul.f32 0.5, %v185_v39  ;;  %v3741_v39 = vmul.f32 0.25, %v3735_v37 }
 0x12f   :  { %v187_v41 = vmul.f32 %v186_v40, %v176_v31 }
 0x131   :  { %2815 = vmatmul.mubr.msk.f32.vlgmr.msra.gmra.mrb[0].mxu1 %vm199_vm3, %v187_v41 }
 0x132   :  { %3067 = vmatpush3.bf16.msra.mxu1 %v3064_v6 }
 0x133   :  { %3069 = vmatprep.subr.bf16.mxu1 %v3068_v9 }
 0x136   :  { %3071 = vmatpush3.bf16.msra.mxu1 %v3068_v9 }
 0x194   :  { %v2827_v42 = vpop.f32.mrb[2].mxu0 }
 0x195   :  { %398 = vst.msk [vmem:[#allocation2 + $0x18] sm:$0xff] %vm199_vm3, %v2827_v42  ;;  %v365_v43 = vpop.f32.mrb[3].mxu0 }
 0x196   :  { %397 = vst.msk [vmem:[#allocation2 + $0x10] sm:$0xff] %vm199_vm3, %v365_v43 }
 0x19c   :  { %v3699_v63 = vld [vmem:[#allocation2 + $0x18] sm:$0xff] }
 0x19d   :  { %v3689_v57 = vld [vmem:[#allocation2 + $0x10] sm:$0xff]  ;;  %v522_v2 = vmul.f32 %v3699_v63, %v3699_v63 }
 0x19e   :  { %v521_v62 = vmul.f32 %v3689_v57, %v3689_v57 }
 0x19f   :  { %v532_v3 = vsel %vm199_vm3, %v522_v2, 0.0 }
 0x1a0   :  { %v529_v0 = vsel %vm199_vm3, %v521_v62, 0.0 }
 0x204   :  { %v269_v49 = vpop.f32.mrb[0].mxu1 }
 0x205   :  { %v270_v50 = vadd.f32 %v2542_v46, %v269_v49  ;;  %v2816_v51 = vpop.f32.mrb[1].mxu1 }
 0x207   :  { %v377_v52 = vrot.slane %v270_v50, %v376_v47  ;;  %v382_v53 = vrot.slane %v270_v50, %v381_v48 }
 0x209   :  { %378 = vst.msk [vmem:[#allocation2] sm:$0xff] %vm105_vm1, %v377_v52  ;;  %383 = vst.msk [vmem:[#allocation2 + $0x8] sm:$0xff] %vm105_vm1, %v382_v53 }
 0x20a   :  { %395 = vst.msk [vmem:[#allocation2] sm:$0xff] %vm394_vm5, %v389_v45  ;;  %396 = vst.msk [vmem:[#allocation2 + $0x8] sm:$0xff] %vm394_vm5, %v391_v54 }
 0x211   :  { %v3685_v55 = vld [vmem:[#allocation2 + $0x8] sm:$0xff]  ;;  %v3687_v56 = vld [vmem:[#allocation2] sm:$0xff] }
 0x212   :  { %v520_v58 = vmul.f32 %v3685_v55, %v3685_v55  ;;  %v519_v59 = vmul.f32 %v3687_v56, %v3687_v56 }
 0x214   :  { %v526_v60 = vsel %vm199_vm3, %v520_v58, 0.0  ;;  %v523_v61 = vsel %vm199_vm3, %v519_v59, 0.0 }
 0x215   :  { %527 = vadd.xlane.f32.xlu1 %v526_v60  ;;  %524 = vadd.xlane.f32.xlu0 %v523_v61 }
 0x219   :  { %530 = vadd.xlane.f32.xlu0 %v529_v0 }
 0x21d   :  { %533 = vadd.xlane.f32.xlu0 %v532_v3 }
 0x2a2   :  { %v528_v10 = vpop.xlane.xlu1 %527  ;;  %v525_v11 = vpop.xlane.xlu0 %524 }
 0x2a3   :  { %v537_v12 = vmul.f32 0.03125, %v528_v10  ;;  %v536_v13 = vmul.f32 0.03125, %v525_v11 }
 0x2a5   :  { %v541_v14 = vadd.f32 1e-06, %v537_v12  ;;  %v540_v15 = vadd.f32 1e-06, %v536_v13  ;;  %v417_v12 = vadd.s32 8, %v3676_v44  ;;  %v419_v13 = vadd.s32 24, %v3676_v44 }
 0x2a6   :  { %v531_v16 = vpop.xlane.xlu0 %530 }
 0x2a7   :  { %3249 = vrsqrt.f32 %v541_v14  ;;  %v538_v17 = vmul.f32 0.03125, %v531_v16  ;;  %v418_v14 = vadd.s32 16, %v3676_v44  ;;  %v424_v16 = vand.u32 31, %v3676_v44 }
 0x2a8   :  { %3251 = vrsqrt.f32 %v540_v15  ;;  %v425_v15 = vand.u32 31, %v417_v12 }
 0x2a9   :  { %v542_v18 = vadd.f32 1e-06, %v538_v17  ;;  %v448_v17 = vshra.s32 %v3662_v24, 3 }
 0x2aa   :  { %v534_v19 = vpop.xlane.xlu0 %533 }
 0x2ab   :  { %3253 = vrsqrt.f32 %v542_v18  ;;  %v539_v20 = vmul.f32 0.03125, %v534_v19  ;;  %v427_v18 = vand.u32 31, %v419_v13  ;;  %v459_v19 = vshra.s32 %v3662_v24, 4 }
 0x2ad   :  { %v543_v21 = vadd.f32 1e-06, %v539_v20  ;;  %v426_v20 = vand.u32 31, %v418_v14 }
 0x2af   :  { %3255 = vrsqrt.f32 %v543_v21  ;;  %v421_v21 = vadd.s32 40, %v3676_v44 }
 0x2b1   :  { %v3250_v22 = vpop.eup %3249 }
 0x2b2   :  { %v3252_v25 = vpop.eup %3251  ;;  %v549_v26 = vmul.f32 %v3250_v22, %v3685_v55  ;;  %v433_v22 = vshra.s32 %v425_v15, 3 }
 0x2b3   :  { %v548_v27 = vmul.f32 %v3252_v25, %v3687_v56  ;;  %v470_v25 = vshra.s32 %v424_v16, 4 }
 0x2b4   :  { %v559_v28 = vmul.f32 %v2550_v23, %v549_v26  ;;  %v420_v26 = vadd.s32 32, %v3676_v44 }
 0x2b5   :  { %v3254_v29 = vpop.eup %3253  ;;  %v558_v30 = vmul.f32 %v2550_v23, %v548_v27  ;;  %v3797_v27 = vand.u32 1, %v448_v17 }
 0x2b6   :  { %v550_v31 = vmul.f32 %v3254_v29, %v3689_v57  ;;  %v473_v29 = vshra.s32 %v427_v18, 4 }
 0x2b7   :  { %2836 = vmatprep.mubr.msk.f32.mxu1 %vm199_vm3, %v558_v30  ;;  %v460_v30 = vshll.u32 %v459_v19, 3 }
 0x2b8   :  { %2837 = vmatmul.mubr.msk.f32.vlgmr.msra.gmra.mrb[2].mxu1 %vm199_vm3, %v559_v28  ;;  %v560_v32 = vmul.f32 %v2550_v23, %v550_v31  ;;  %v458_v28 = vand.u32 7, %v3662_v24  ;;  %v463_v31 = vand.u32 7, %v425_v15  ;;  %v464_v24 = vand.u32 7, %v426_v20 }
 0x2b9   :  { %v3256_v33 = vpop.eup %3255 }
 0x2ba   :  { %2839 = vmatprep.mubr.msk.f32.mxu1 %vm199_vm3, %v560_v32  ;;  %v551_v34 = vmul.f32 %v3256_v33, %v3699_v63  ;;  %v472_v32 = vshra.s32 %v426_v20, 4  ;;  %v429_v33 = vand.u32 31, %v421_v21 }
 0x2bc   :  { %v561_v35 = vmul.f32 %v2550_v23, %v551_v34  ;;  %v471_v23 = vshra.s32 %v425_v15, 4  ;;  %v441_v34 = vand.u32 1, %v433_v22 }
 0x2be   :  { %2840 = vmatmul.mubr.msk.f32.gmra.mrb[4].mxu1 %vm199_vm3, %v561_v35  ;;  %v479_v35 = vshll.u32 %v471_v23, 3  ;;  %vm451_vm11 = vcmp.eq.s32.totalorder %v441_v34, %v3797_v27 }
 0x38b   :  { %v2838_v40 = vpop.f32.mrb[2].mxu1 }
 0x38c   :  { %v664_v41 = vmul.f32 %v2838_v40, %v3738_v38  ;;  %v672_v42 = vmul.f32 %v2838_v40, %v3741_v39  ;;  %v644_v43 = vpop.f32.mrb[3].mxu1 }
 0x38d   :  { %v663_v45 = vmul.f32 %v644_v43, %v3738_v38  ;;  %v671_v46 = vmul.f32 %v644_v43, %v3741_v39  ;;  %v3747_v47 = vpack.i.bf16 %v2838_v40, %v644_v43  ;;  %v432_v40 = vshra.s32 %v424_v16, 3 }
 0x38e   :  { %668 = vst.msk [vmem:[#allocation3 + $0x8] sm:$0xff] %vm199_vm3, %v664_v41  ;;  %676 = vst.msk [vmem:[#allocation3 + $0x28] sm:$0xff] %vm199_vm3, %v672_v42  ;;  %v423_v41 = vadd.s32 56, %v3676_v44  ;;  %v462_v42 = vand.u32 7, %v424_v16  ;;  %v478_v43 = vshll.u32 %v470_v25, 3 }
 0x38f   :  { %667 = vst.msk [vmem:[#allocation3] sm:$0xff] %vm199_vm3, %v663_v45  ;;  %675 = vst.msk [vmem:[#allocation3 + $0x20] sm:$0xff] %vm199_vm3, %v671_v46  ;;  %3208 = vrot.lane.b32.xlu1 %v3747_v47, %s3485_s0  ;;  %v428_v45 = vand.u32 31, %v420_v26  ;;  %v422_v46 = vadd.s32 48, %v3676_v44  ;;  %v3486_v25 = vmov -1e+30  }
 0x391   :  { %v2841_v1 = vpop.f32.mrb[4].mxu1 }
 0x392   :  { %v666_v48 = vmul.f32 %v2841_v1, %v3738_v38  ;;  %v674_v49 = vmul.f32 %v2841_v1, %v3741_v39  ;;  %v654_v50 = vpop.f32.mrb[5].mxu1 }
 0x393   :  { %v665_v51 = vmul.f32 %v654_v50, %v3738_v38  ;;  %v673_v52 = vmul.f32 %v654_v50, %v3741_v39  ;;  %v3759_v53 = vpack.i.bf16 %v2841_v1, %v654_v50  ;;  %v435_v1 = vshra.s32 %v427_v18, 3 }
 0x394   :  { %670 = vst.msk [vmem:[#allocation3 + $0x18] sm:$0xff] %vm199_vm3, %v666_v48  ;;  %678 = vst.msk [vmem:[#allocation3 + $0x38] sm:$0xff] %vm199_vm3, %v674_v49  ;;  %v465_v48 = vand.u32 7, %v427_v18  ;;  %v481_v49 = vshll.u32 %v473_v29, 3  ;;  %v434_v50 = vshra.s32 %v426_v20, 3 }
 0x395   :  { %669 = vst.msk [vmem:[#allocation3 + $0x10] sm:$0xff] %vm199_vm3, %v665_v51  ;;  %677 = vst.msk [vmem:[#allocation3 + $0x30] sm:$0xff] %vm199_vm3, %v673_v52  ;;  %3213 = vrot.lane.b32.xlu0 %v3759_v53, %s3485_s0  ;;  %v680_v5 = vld [vmem:[#allocation3 + $0x8] sm:$0xff]  ;;  %v480_v51 = vshll.u32 %v472_v32, 3  ;;  %v475_v52 = vshra.s32 %v429_v33, 4 }
 0x396   :  { %v679_v54 = vld [vmem:[#allocation3] sm:$0xff]  ;;  %v684_v9 = vld [vmem:[#allocation3 + $0x28] sm:$0xff]  ;;  %v442_v44 = vand.u32 1, %v434_v50 }
 0x397   :  { %2850 = vmatprep.mubr.msk.f32.mxu0 %vm199_vm3, %v679_v54  ;;  %v683_v8 = vld [vmem:[#allocation3 + $0x20] sm:$0xff]  ;;  %v3802_v54 = vadd.s32 %v460_v30, %v458_v28 }
 0x398   :  { %vm452_vm2 = vcmp.eq.s32.totalorder %v442_v44, %v3797_v27 }
 0x39b   :  { %v682_v7 = vld [vmem:[#allocation3 + $0x18] sm:$0xff] }
 0x39c   :  { %v681_v6 = vld [vmem:[#allocation3 + $0x10] sm:$0xff]  ;;  %v686_v11 = vld [vmem:[#allocation3 + $0x38] sm:$0xff] }
 0x39d   :  { %v685_v10 = vld [vmem:[#allocation3 + $0x30] sm:$0xff] }
 0x401   :  { %v3209_v58 = vpop.permute.xlu1 %3208 }
 0x402   :  { %v3211_v59 = vunpack.i.h.bf16 %v3209_v58  ;;  %v3210_v60 = vunpack.i.l.bf16 %v3209_v58  ;;  %v487_v58 = vadd.s32 %v479_v35, %v463_v31 }
 0x404   :  { %v3072_v62 = vpack.c.bf16 %v3211_v59, %v3210_v60  ;;  %v440_v59 = vand.u32 1, %v432_v40  ;;  %v431_v60 = vand.u32 31, %v423_v41  ;;  %vm495_vm12 = vcmp.le.s32.totalorder %v3802_v54, %v487_v58 }
 0x405   :  { %vm503_vm1 = vmand %vm451_vm11, %vm495_vm12 }
 0x406   :  { %3074 = vmatprep.subr.msk.bf16.mxu0 %vm3770_vm10, %v3072_v62  ;;  %vm450_vm13 = vcmp.eq.s32.totalorder %v440_v59, %v3797_v27  ;;  %v439_v17 = vshra.s32 %v431_v60, 3  ;;  %v469_v18 = vand.u32 7, %v431_v60  ;;  %v3814_v26 = vsel %vm503_vm1, 0.0, %v3486_v25 }
 0x407   :  { %3077 = vmatpush3.bf16.xpose.msk.msra.mxu0 %vm3770_vm10, %v3072_v62  ;;  %v3214_v0 = vpop.permute.xlu0 %3213  ;;  %v486_v62 = vadd.s32 %v478_v43, %v462_v42 }
 0x408   :  { %v3216_v2 = vunpack.i.h.bf16 %v3214_v0  ;;  %v3215_v3 = vunpack.i.l.bf16 %v3214_v0  ;;  %v474_v0 = vshra.s32 %v428_v45, 4  ;;  %v447_v30 = vand.u32 1, %v439_v17 }
 0x409   :  { %vm494_vm14 = vcmp.le.s32.totalorder %v3802_v54, %v486_v62 }
 0x40a   :  { %v3078_v4 = vpack.c.bf16 %v3216_v2, %v3215_v3  ;;  %v430_v2 = vand.u32 31, %v422_v46  ;;  %v443_v3 = vand.u32 1, %v435_v1  ;;  %v482_v12 = vshll.u32 %v474_v0, 3  ;;  %vm502_vm5 = vmand %vm450_vm13, %vm494_vm14 }
 0x40b   :  { %v3816_v28 = vsel %vm502_vm5, 0.0, %v3486_v25 }
 0x40c   :  { %3080 = vmatprep.subr.msk.bf16.mxu0 %vm3770_vm10, %v3078_v4  ;;  %v476_v13 = vshra.s32 %v430_v2, 4  ;;  %vm453_vm15 = vcmp.eq.s32.totalorder %v443_v3, %v3797_v27  ;;  %v438_v21 = vshra.s32 %v430_v2, 3  ;;  %v468_v22 = vand.u32 7, %v430_v2 }
 0x40e   :  { %v484_v23 = vshll.u32 %v476_v13, 3  ;;  %v446_v34 = vand.u32 1, %v438_v21 }
 0x40f   :  { %3083 = vmatpush3.bf16.xpose.msk.msra.mxu0 %vm3770_vm10, %v3078_v4  ;;  %v489_v4 = vadd.s32 %v481_v49, %v465_v48 }
 0x410   :  { %v492_v35 = vadd.s32 %v484_v23, %v468_v22  ;;  %vm456_vm1 = vcmp.eq.s32.totalorder %v446_v34, %v3797_v27 }
 0x411   :  { %vm497_vm0 = vcmp.le.s32.totalorder %v3802_v54, %v489_v4 }
 0x412   :  { %vm505_vm6 = vmand %vm453_vm15, %vm497_vm0  ;;  %vm457_vm15 = vcmp.eq.s32.totalorder %v447_v30, %v3797_v27 }
 0x413   :  { %v3832_v41 = vsel %vm505_vm6, 0.0, %v3486_v25  ;;  %vm1362_vm6 = vcmask 523264  }
 0x416   :  { %2851 = vmatmul.mubr.msk.f32.vlgmr.msra.gmra.mrb[4].mxu0 %vm199_vm3, %v680_v5  ;;  %v488_v5 = vadd.s32 %v480_v51, %v464_v24 }
 0x417   :  { %2853 = vmatprep.mubr.msk.f32.mxu0 %vm199_vm3, %v681_v6  ;;  %v437_v6 = vshra.s32 %v429_v33, 3 }
 0x418   :  { %vm496_vm4 = vcmp.le.s32.totalorder %v3802_v54, %v488_v5 }
 0x419   :  { %v445_v14 = vand.u32 1, %v437_v6  ;;  %vm504_vm8 = vmand %vm452_vm2, %vm496_vm4  ;;  %vm500_vm2 = vcmp.le.s32.totalorder %v3802_v54, %v492_v35 }
 0x41a   :  { %2854 = vmatmul.mubr.msk.f32.gmra.mrb[6].mxu0 %vm199_vm3, %v682_v7  ;;  %v467_v7 = vand.u32 7, %v429_v33  ;;  %v3835_v43 = vsel %vm504_vm8, 0.0, %v3486_v25  ;;  %vm508_vm5 = vmand %vm456_vm1, %vm500_vm2 }
 0x41b   :  { %2856 = vmatprep.mubr.msk.f32.mxu0 %vm199_vm3, %v683_v8  ;;  %v483_v8 = vshll.u32 %v475_v52, 3  ;;  %vm455_vm7 = vcmp.eq.s32.totalorder %v445_v14, %v3797_v27  ;;  %v3859_v0 = vsel %vm508_vm5, 0.0, %v3486_v25 }
 0x41d   :  { %v491_v15 = vadd.s32 %v483_v8, %v467_v7 }
 0x41e   :  { %2857 = vmatmul.mubr.msk.f32.gmra.mrb[8].mxu0 %vm199_vm3, %v684_v9  ;;  %v436_v9 = vshra.s32 %v428_v45, 3 }
 0x41f   :  { %2859 = vmatprep.mubr.msk.f32.mxu0 %vm199_vm3, %v685_v10  ;;  %v477_v10 = vshra.s32 %v431_v60, 4  ;;  %vm499_vm9 = vcmp.le.s32.totalorder %v3802_v54, %v491_v15 }
 0x420   :  { %v444_v16 = vand.u32 1, %v436_v9  ;;  %vm507_vm13 = vmand %vm455_vm7, %vm499_vm9 }
 0x421   :  { %v485_v19 = vshll.u32 %v477_v10, 3  ;;  %v3848_v50 = vsel %vm507_vm13, 0.0, %v3486_v25 }
 0x422   :  { %2860 = vmatmul.mubr.msk.f32.gmra.mrb[10].mxu0 %vm199_vm3, %v686_v11  ;;  %v466_v11 = vand.u32 7, %v428_v45  ;;  %vm454_vm11 = vcmp.eq.s32.totalorder %v444_v16, %v3797_v27 }
 0x423   :  { %v493_v31 = vadd.s32 %v485_v19, %v469_v18 }
 0x424   :  { %v490_v20 = vadd.s32 %v482_v12, %v466_v11 }
 0x425   :  { %vm501_vm0 = vcmp.le.s32.totalorder %v3802_v54, %v493_v31 }
 0x426   :  { %vm498_vm12 = vcmp.le.s32.totalorder %v3802_v54, %v490_v20  ;;  %vm509_vm4 = vmand %vm457_vm15, %vm501_vm0 }
 0x427   :  { %vm506_vm14 = vmand %vm454_vm11, %vm498_vm12  ;;  %v3856_v54 = vsel %vm509_vm4, 0.0, %v3486_v25 }
 0x428   :  { %v3851_v51 = vsel %vm506_vm14, 0.0, %v3486_v25 }
 0x4e9   :  { %v2852_v29 = vpop.f32.mrb[4].mxu0 }
 0x4ea   :  { %v803_v32 = vadd.f32 %v2852_v29, %v3814_v26  ;;  %v797_v33 = vpop.f32.mrb[5].mxu0 }
 0x4eb   :  { %v798_v40 = vadd.f32 %v797_v33, %v3816_v28 }
 0x4ec   :  { %v839_v42 = vsel %vm199_vm3, %v803_v32, -inf }
 0x4ed   :  { %840 = vmax.xlane.f32.xlu0 %v839_v42  ;;  %v2855_v45 = vpop.f32.mrb[6].mxu0  ;;  %v836_v46 = vsel %vm199_vm3, %v798_v40, -inf }
 0x4ee   :  { %v813_v1 = vadd.f32 %v2855_v45, %v3832_v41  ;;  %837 = vmax.xlane.f32.xlu1 %v836_v46  ;;  %v807_v48 = vpop.f32.mrb[7].mxu0 }
 0x4ef   :  { %v808_v49 = vadd.f32 %v807_v48, %v3835_v43 }
 0x4f0   :  { %v845_v24 = vsel %vm199_vm3, %v813_v1, -inf }
 0x4f1   :  { %846 = vmax.xlane.f32.xlu0 %v845_v24  ;;  %v2858_v52 = vpop.f32.mrb[8].mxu0  ;;  %v842_v58 = vsel %vm199_vm3, %v808_v49, -inf }
 0x4f2   :  { %v823_v59 = vadd.f32 %v2858_v52, %v3848_v50  ;;  %v817_v60 = vpop.f32.mrb[9].mxu0  ;;  %843 = vmax.xlane.f32.xlu1 %v842_v58 }
 0x4f3   :  { %v818_v27 = vadd.f32 %v817_v60, %v3851_v51 }
 0x4f4   :  { %v851_v62 = vsel %vm199_vm3, %v823_v59, -inf }
 0x4f5   :  { %852 = vmax.xlane.f32.xlu0 %v851_v62  ;;  %v2861_v2 = vpop.f32.mrb[10].mxu0  ;;  %v848_v3 = vsel %vm199_vm3, %v818_v27, -inf }
 0x4f6   :  { %v833_v4 = vadd.f32 %v2861_v2, %v3856_v54  ;;  %v827_v44 = vpop.f32.mrb[11].mxu0  ;;  %849 = vmax.xlane.f32.xlu1 %v848_v3 }
 0x4f7   :  { %v828_v5 = vadd.f32 %v827_v44, %v3859_v0 }
 0x4f8   :  { %v857_v6 = vsel %vm199_vm3, %v833_v4, -inf }
 0x4f9   :  { %858 = vmax.xlane.f32.xlu0 %v857_v6  ;;  %v854_v7 = vsel %vm199_vm3, %v828_v5, -inf }
 0x4fa   :  { %855 = vmax.xlane.f32.xlu1 %v854_v7 }
 0x57a   :  { %v841_v8 = vpop.xlane.xlu0 %840 }
 0x57b   :  { %v861_v9 = vsub.f32 %v803_v32, %v841_v8  ;;  %v838_v10 = vpop.xlane.xlu1 %837 }
 0x57c   :  { %v860_v11 = vsub.f32 %v798_v40, %v838_v10 }
 0x57d   :  { %v870_v12 = vmul.f32 1.442695, %v861_v9 }
 0x57e   :  { %v868_v13 = vmul.f32 1.442695, %v860_v11  ;;  %v847_v14 = vpop.xlane.xlu0 %846 }
 0x57f   :  { %3257 = vpow2.f32 %v870_v12  ;;  %v863_v15 = vsub.f32 %v813_v1, %v847_v14  ;;  %v844_v16 = vpop.xlane.xlu1 %843 }
 0x580   :  { %3259 = vpow2.f32 %v868_v13  ;;  %v862_v17 = vsub.f32 %v808_v49, %v844_v16 }
 0x581   :  { %v874_v18 = vmul.f32 1.442695, %v863_v15 }
 0x582   :  { %v872_v19 = vmul.f32 1.442695, %v862_v17  ;;  %v853_v20 = vpop.xlane.xlu0 %852 }
 0x583   :  { %3261 = vpow2.f32 %v874_v18  ;;  %v865_v21 = vsub.f32 %v823_v59, %v853_v20  ;;  %v850_v22 = vpop.xlane.xlu1 %849  ;;  %v1077_v18 = vld [vmem:[%s4262_s9] sm:$0xff] }
 0x584   :  { %3263 = vpow2.f32 %v872_v19  ;;  %v864_v23 = vsub.f32 %v818_v27, %v850_v22  ;;  %v1078_v19 = vld [vmem:[%s4262_s9 + $0x8] sm:$0xff] }
 0x585   :  { %v878_v25 = vmul.f32 1.442695, %v865_v21  ;;  %v3092_v21 = vpack.c.bf16 %v1078_v19, %v1077_v18 }
 0x586   :  { %v876_v29 = vmul.f32 1.442695, %v864_v23  ;;  %v859_v30 = vpop.xlane.xlu0 %858 }
 0x587   :  { %3265 = vpow2.f32 %v878_v25  ;;  %v867_v31 = vsub.f32 %v833_v4, %v859_v30  ;;  %v856_v32 = vpop.xlane.xlu1 %855 }
 0x588   :  { %3267 = vpow2.f32 %v876_v29  ;;  %v866_v33 = vsub.f32 %v828_v5, %v856_v32 }
 0x589   :  { %v3866_v34 = vpop.eup %3257  ;;  %v882_v35 = vmul.f32 1.442695, %v867_v31 }
 0x58a   :  { %v3260_v40 = vpop.eup %3259  ;;  %v880_v42 = vmul.f32 1.442695, %v866_v33  ;;  %v887_v45 = vsel %vm199_vm3, %v3866_v34, 0.0 }
 0x58b   :  { %3269 = vpow2.f32 %v882_v35  ;;  %888 = vadd.xlane.f32.xlu0 %v887_v45  ;;  %v884_v46 = vsel %vm199_vm3, %v3260_v40, 0.0 }
 0x58c   :  { %3271 = vpow2.f32 %v880_v42  ;;  %885 = vadd.xlane.f32.xlu1 %v884_v46 }
 0x58d   :  { %v3871_v1 = vpop.eup %3261 }
 0x58e   :  { %v3264_v48 = vpop.eup %3263  ;;  %v893_v49 = vsel %vm199_vm3, %v3871_v1, 0.0 }
 0x58f   :  { %894 = vadd.xlane.f32.xlu0 %v893_v49  ;;  %v890_v24 = vsel %vm199_vm3, %v3264_v48, 0.0 }
 0x590   :  { %891 = vadd.xlane.f32.xlu1 %v890_v24 }
 0x591   :  { %v3876_v52 = vpop.eup %3265 }
 0x592   :  { %v3268_v58 = vpop.eup %3267  ;;  %v899_v59 = vsel %vm199_vm3, %v3876_v52, 0.0 }
 0x593   :  { %900 = vadd.xlane.f32.xlu0 %v899_v59  ;;  %v896_v60 = vsel %vm199_vm3, %v3268_v58, 0.0 }
 0x594   :  { %897 = vadd.xlane.f32.xlu1 %v896_v60 }
 0x595   :  { %v3881_v27 = vpop.eup %3269 }
 0x596   :  { %v3272_v62 = vpop.eup %3271  ;;  %v905_v2 = vsel %vm199_vm3, %v3881_v27, 0.0 }
 0x597   :  { %906 = vadd.xlane.f32.xlu0 %v905_v2  ;;  %v902_v3 = vsel %vm199_vm3, %v3272_v62, 0.0 }
 0x598   :  { %903 = vadd.xlane.f32.xlu1 %v902_v3 }
 0x5a9   :  { %3218 = vrot.lane.b32.xlu1 %v3747_v47, %s3487_s15 }
 0x5ad   :  { %3223 = vrot.lane.b32.xlu0 %v3759_v53, %s3487_s15 }
 0x618   :  { %v889_v4 = vpop.xlane.xlu0 %888 }
 0x619   :  { %v886_v44 = vpop.xlane.xlu1 %885 }
 0x61a   :  { %3273 = vrcp.f32 %v886_v44 }
 0x61b   :  { %3275 = vrcp.f32 %v889_v4 }
 0x61c   :  { %v895_v5 = vpop.xlane.xlu0 %894 }
 0x61d   :  { %v892_v6 = vpop.xlane.xlu1 %891 }
 0x61e   :  { %3277 = vrcp.f32 %v892_v6 }
 0x61f   :  { %3279 = vrcp.f32 %v895_v5 }
 0x620   :  { %v901_v7 = vpop.xlane.xlu0 %900 }
 0x621   :  { %v898_v8 = vpop.xlane.xlu1 %897 }
 0x622   :  { %3281 = vrcp.f32 %v898_v8 }
 0x623   :  { %3283 = vrcp.f32 %v901_v7 }
 0x624   :  { %v3274_v9 = vpop.eup %3273  ;;  %v907_v10 = vpop.xlane.xlu0 %906 }
 0x625   :  { %v904_v11 = vpop.xlane.xlu1 %903  ;;  %v916_v12 = vmul.f32 %v3274_v9, %v3260_v40  ;;  %v3276_v22 = vpop.eup %3275 }
 0x626   :  { %3285 = vrcp.f32 %v904_v11  ;;  %v917_v25 = vmul.f32 %v3276_v22, %v3866_v34 }
 0x627   :  { %2870 = vmatprep.mubr.msk.f32.mxu1 %vm199_vm3, %v916_v12  ;;  %3287 = vrcp.f32 %v907_v10 }
 0x628   :  { %v3224_v13 = vpop.permute.xlu0 %3223  ;;  %v3278_v23 = vpop.eup %3277 }
 0x629   :  { %v3219_v47 = vpop.permute.xlu1 %3218  ;;  %v3226_v14 = vunpack.i.h.bf16 %v3224_v13  ;;  %v3225_v15 = vunpack.i.l.bf16 %v3224_v13  ;;  %v3280_v29 = vpop.eup %3279  ;;  %v918_v30 = vmul.f32 %v3278_v23, %v3264_v48  ;;  %v1080_v48 = vld [vmem:[%s4262_s9 + $0x18] sm:$0xff] }
 0x62a   :  { %v3221_v53 = vunpack.i.h.bf16 %v3219_v47  ;;  %v3220_v16 = vunpack.i.l.bf16 %v3219_v47  ;;  %v919_v32 = vmul.f32 %v3280_v29, %v3871_v1  ;;  %v1079_v1 = vld [vmem:[%s4262_s9 + $0x10] sm:$0xff]  ;;  %v1226_v29 = vld [vmem:[%s4263_s10 + $0x8] sm:$0xff] }
 0x62b   :  { %v3088_v20 = vpack.c.bf16 %v3226_v14, %v3225_v15  ;;  %v3096_v49 = vpack.c.bf16 %v1080_v48, %v1079_v1 }
 0x62c   :  { %v3084_v17 = vpack.c.bf16 %v3221_v53, %v3220_v16  ;;  %v3282_v31 = vpop.eup %3281 }
 0x62d   :  { %v3284_v33 = vpop.eup %3283  ;;  %v920_v35 = vmul.f32 %v3282_v31, %v3268_v58  ;;  %v1227_v31 = vld [vmem:[%s4263_s10 + $0x10] sm:$0xff] }
 0x62e   :  { %3085 = vmatprep.subr.bf16.mxu1 %v3084_v17  ;;  %v921_v34 = vmul.f32 %v3284_v33, %v3876_v52 }
 0x62f   :  { %3087 = vmatpush3.bf16.msra.mxu1 %v3084_v17 }
 0x630   :  { %3089 = vmatprep.subr.bf16.mxu1 %v3088_v20  ;;  %v3286_v40 = vpop.eup %3285 }
 0x631   :  { %v3288_v42 = vpop.eup %3287  ;;  %v922_v45 = vmul.f32 %v3286_v40, %v3272_v62 }
 0x632   :  { %v923_v46 = vmul.f32 %v3288_v42, %v3881_v27 }
 0x633   :  { %3091 = vmatpush3.bf16.msra.mxu1 %v3088_v20 }
 0x634   :  { %3093 = vmatprep.subr.bf16.mxu1 %v3092_v21 }
 0x636   :  { %2871 = vmatmul.mubr.msk.f32.vlgmr.msra.gmra.mrb[6].mxu1 %vm199_vm3, %v917_v25 }
 0x637   :  { %2873 = vmatprep.mubr.msk.f32.mxu1 %vm199_vm3, %v918_v30  ;;  %3095 = vmatpush3.bf16.msra.mxu1 %v3092_v21 }
 0x638   :  { %3097 = vmatprep.subr.bf16.mxu1 %v3096_v49 }
 0x63a   :  { %2874 = vmatmul.mubr.msk.f32.gmra.mrb[8].mxu1 %vm199_vm3, %v919_v32  ;;  %v1228_v32 = vld [vmem:[%s4263_s10 + $0x18] sm:$0xff] }
 0x63b   :  { %2876 = vmatprep.mubr.msk.f32.mxu1 %vm199_vm3, %v920_v35  ;;  %3099 = vmatpush3.bf16.msra.mxu1 %v3096_v49  ;;  %v3104_v33 = vpack.c.bf16 %v1228_v32, %v1227_v31 }
 0x63e   :  { %2877 = vmatmul.mubr.msk.f32.gmra.mrb[10].mxu1 %vm199_vm3, %v921_v34 }
 0x63f   :  { %2879 = vmatprep.mubr.msk.f32.mxu1 %vm199_vm3, %v922_v45 }
 0x642   :  { %2880 = vmatmul.mubr.msk.f32.gmra.mrb[12].mxu1 %vm199_vm3, %v923_v46 }
 0x709   :  { %v2872_v24 = vpop.f32.mrb[6].mxu1 }
 0x70a   :  { %v1026_v52 = vpop.f32.mrb[7].mxu1  ;;  %v1066_v27 = vmul.f32 %v2872_v24, %v3732_v36 }
 0x70b   :  { %v1065_v3 = vmul.f32 %v3732_v36, %v1026_v52 }
 0x70d   :  { %v2875_v58 = vpop.f32.mrb[8].mxu1 }
 0x70e   :  { %v1036_v59 = vpop.f32.mrb[9].mxu1  ;;  %v1068_v7 = vmul.f32 %v2875_v58, %v3732_v36 }
 0x70f   :  { %v1067_v10 = vmul.f32 %v3732_v36, %v1036_v59 }
 0x711   :  { %v2878_v60 = vpop.f32.mrb[10].mxu1 }
 0x712   :  { %v1070_v62 = vmul.f32 %v2878_v60, %v3735_v37  ;;  %v1046_v2 = vpop.f32.mrb[11].mxu1 }
 0x713   :  { %v1069_v4 = vmul.f32 %v3735_v37, %v1046_v2 }
 0x714   :  { %v1074_v44 = vadd.f32 %v1070_v62, %v1066_v27  ;;  %v2579_v62 = vld [vmem:[%s4266_s13] ss:$0 sm:$0xff] }
 0x715   :  { %v1073_v5 = vadd.f32 %v1069_v4, %v1065_v3  ;;  %v2881_v6 = vpop.f32.mrb[12].mxu1 }
 0x716   :  { %v1072_v8 = vmul.f32 %v2881_v6, %v3735_v37  ;;  %v1056_v9 = vpop.f32.mrb[13].mxu1 }
 0x717   :  { %v1071_v11 = vmul.f32 %v3735_v37, %v1056_v9  ;;  %2890 = vmatprep.mubr.msk.f32.mxu1 %vm199_vm3, %v1073_v5 }
 0x718   :  { %v1076_v12 = vadd.f32 %v1072_v8, %v1068_v7  ;;  %2891 = vmatmul.mubr.msk.f32.vlgmr.msra.gmra.mrb[14].mxu1 %vm199_vm3, %v1074_v44 }
 0x719   :  { %v1075_v13 = vadd.f32 %v1071_v11, %v1067_v10  ;;  %v1354_v10 = vld [vmem:[%s4264_s11] sm:$0xff]  ;;  %v1355_v11 = vld [vmem:[%s4264_s11 + $0x8] sm:$0xff] }
 0x71b   :  { %2893 = vmatprep.mubr.msk.f32.mxu1 %vm199_vm3, %v1075_v13  ;;  %v1356_v13 = vld [vmem:[%s4264_s11 + $0x10] sm:$0xff] }
 0x71c   :  { %2894 = vmatmul.mubr.msk.f32.gmra.mrb[16].mxu1 %vm199_vm3, %v1076_v12  ;;  %v3108_v12 = vpack.c.bf16 %v1355_v11, %v1354_v10 }
 0x71e   :  { %3109 = vmatprep.subr.bf16.mxu1 %v3108_v12 }
 0x71f   :  { %3111 = vmatpush3.bf16.msra.mxu1 %v3108_v12  ;;  %v2595_v12 = vld [vmem:[%s4261_s8 + $0x28] sm:$0xff] }
 0x7eb   :  { %v2892_v47 = vpop.f32.mrb[14].mxu1 }
 0x7ec   :  { %v3927_v14 = vadd.f32 %v2892_v47, %v3685_v55  ;;  %v1159_v15 = vpop.f32.mrb[15].mxu1  ;;  %v1357_v47 = vld [vmem:[%s4264_s11 + $0x18] sm:$0xff] }
 0x7ed   :  { %v3930_v53 = vadd.f32 %v1159_v15, %v3687_v56  ;;  %v3112_v15 = vpack.c.bf16 %v1357_v47, %v1356_v13  ;;  %v2596_v47 = vld [vmem:[%s4261_s8 + $0x30] sm:$0xff] }
 0x7ee   :  { %v1184_v16 = vmul.f32 %v3927_v14, %v3927_v14 }
 0x7ef   :  { %v2895_v17 = vpop.f32.mrb[16].mxu1  ;;  %v1183_v18 = vmul.f32 %v3930_v53, %v3930_v53  ;;  %3113 = vmatprep.subr.bf16.mxu1 %v3112_v15 }
 0x7f0   :  { %v3937_v19 = vadd.f32 %v2895_v17, %v3699_v63  ;;  %v1169_v20 = vpop.f32.mrb[17].mxu1  ;;  %v1190_v21 = vsel %vm199_vm3, %v1184_v16, 0.0  ;;  %3115 = vmatpush3.bf16.msra.mxu1 %v3112_v15  ;;  %v1358_v16 = vld [vmem:[%s4264_s11 + $0x20] sm:$0xff]  ;;  %v1359_v17 = vld [vmem:[%s4264_s11 + $0x28] sm:$0xff]  ;;  %v2597_v15 = vld [vmem:[%s4261_s8 + $0x38] sm:$0xff] }
 0x7f1   :  { %v3941_v55 = vadd.f32 %v1169_v20, %v3689_v57  ;;  %1191 = vadd.xlane.f32.xlu0 %v1190_v21  ;;  %v1187_v56 = vsel %vm199_vm3, %v1183_v18, 0.0  ;;  %v1225_v57 = vld [vmem:[%s4263_s10] sm:$0xff]  ;;  %v3116_v18 = vpack.c.bf16 %v1359_v17, %v1358_v16  ;;  %v1360_v20 = vld [vmem:[%s4264_s11 + $0x30] sm:$0xff]  ;;  %v1361_v21 = vld [vmem:[%s4264_s11 + $0x38] sm:$0xff]  ;;  %v3128_v16 = vpack.c.bf16 %v2597_v15, %v2596_v47 }
 0x7f2   :  { %1188 = vadd.xlane.f32.xlu1 %v1187_v56  ;;  %v1186_v22 = vmul.f32 %v3937_v19, %v3937_v19  ;;  %v3100_v30 = vpack.c.bf16 %v1226_v29, %v1225_v57  ;;  %v3120_v56 = vpack.c.bf16 %v1361_v21, %v1360_v20 }
 0x7f3   :  { %v1185_v23 = vmul.f32 %v3941_v55, %v3941_v55  ;;  %3117 = vmatprep.subr.bf16.mxu1 %v3116_v18 }
 0x7f4   :  { %v1196_v25 = vsel %vm199_vm3, %v1186_v22, 0.0  ;;  %3101 = vmatprep.subr.bf16.mxu0 %v3100_v30  ;;  %3119 = vmatpush3.bf16.msra.mxu1 %v3116_v18 }
 0x7f5   :  { %1197 = vadd.xlane.f32.xlu0 %v1196_v25  ;;  %v1193_v63 = vsel %vm199_vm3, %v1185_v23, 0.0  ;;  %3103 = vmatpush3.bf16.msra.mxu0 %v3100_v30 }
 0x7f6   :  { %1194 = vadd.xlane.f32.xlu1 %v1193_v63  ;;  %3105 = vmatprep.subr.bf16.mxu0 %v3104_v33 }
 0x7f7   :  { %3121 = vmatprep.subr.bf16.mxu1 %v3120_v56 }
 0x7f8   :  { %3123 = vmatpush3.bf16.msra.mxu1 %v3120_v56 }
 0x7f9   :  { %3107 = vmatpush3.bf16.msra.mxu0 %v3104_v33 }
 0x87e   :  { %v1192_v35 = vpop.xlane.xlu0 %1191 }
 0x87f   :  { %v1200_v40 = vmul.f32 0.03125, %v1192_v35  ;;  %v1189_v34 = vpop.xlane.xlu1 %1188 }
 0x880   :  { %v1199_v42 = vmul.f32 0.03125, %v1189_v34 }
 0x881   :  { %v1204_v45 = vadd.f32 1e-06, %v1200_v40 }
 0x882   :  { %v1203_v46 = vadd.f32 1e-06, %v1199_v42  ;;  %v1198_v1 = vpop.xlane.xlu0 %1197 }
 0x883   :  { %3289 = vrsqrt.f32 %v1204_v45  ;;  %v1202_v48 = vmul.f32 0.03125, %v1198_v1  ;;  %v1195_v49 = vpop.xlane.xlu1 %1194 }
 0x884   :  { %3291 = vrsqrt.f32 %v1203_v46  ;;  %v1201_v24 = vmul.f32 0.03125, %v1195_v49 }
 0x885   :  { %v1206_v52 = vadd.f32 1e-06, %v1202_v48 }
 0x886   :  { %v1205_v58 = vadd.f32 1e-06, %v1201_v24 }
 0x887   :  { %3293 = vrsqrt.f32 %v1206_v52 }
 0x888   :  { %3295 = vrsqrt.f32 %v1205_v58 }
 0x88d   :  { %v3290_v59 = vpop.eup %3289 }
 0x88e   :  { %v3292_v60 = vpop.eup %3291  ;;  %v1212_v27 = vmul.f32 %v3290_v59, %v3927_v14 }
 0x88f   :  { %v1211_v2 = vmul.f32 %v3292_v60, %v3930_v53 }
 0x890   :  { %v1222_v5 = vmul.f32 %v2579_v62, %v1212_v27 }
 0x891   :  { %v3294_v3 = vpop.eup %3293  ;;  %v1221_v4 = vmul.f32 %v2579_v62, %v1211_v2 }
 0x892   :  { %v3296_v44 = vpop.eup %3295  ;;  %v1214_v6 = vmul.f32 %v3294_v3, %v3937_v19 }
 0x893   :  { %2904 = vmatprep.mubr.msk.f32.mxu0 %vm199_vm3, %v1221_v4  ;;  %v1213_v7 = vmul.f32 %v3296_v44, %v3941_v55 }
 0x894   :  { %2905 = vmatmul.mubr.msk.f32.vlgmr.msra.gmra.mrb[12].mxu0 %vm199_vm3, %v1222_v5  ;;  %v1224_v9 = vmul.f32 %v2579_v62, %v1214_v6 }
 0x895   :  { %v1223_v8 = vmul.f32 %v2579_v62, %v1213_v7 }
 0x897   :  { %2907 = vmatprep.mubr.msk.f32.mxu0 %vm199_vm3, %v1223_v8 }
 0x898   :  { %2908 = vmatmul.mubr.msk.f32.gmra.mrb[14].mxu0 %vm199_vm3, %v1224_v9 }
 0x967   :  { %v2906_v22 = vpop.f32.mrb[12].mxu0 }
 0x968   :  { %v2585_v23 = vmul.f32 -1.442695, %v2906_v22  ;;  %v1307_v25 = vpop.f32.mrb[13].mxu0 }
 0x969   :  { %v2584_v63 = vmul.f32 -1.442695, %v1307_v25 }
 0x96a   :  { %3297 = vpow2.f32 %v2585_v23 }
 0x96b   :  { %3299 = vpow2.f32 %v2584_v63  ;;  %v2909_v57 = vpop.f32.mrb[14].mxu0 }
 0x96c   :  { %v2587_v29 = vmul.f32 -1.442695, %v2909_v57  ;;  %v1317_v30 = vpop.f32.mrb[15].mxu0 }
 0x96d   :  { %v2586_v31 = vmul.f32 -1.442695, %v1317_v30 }
 0x96e   :  { %3301 = vpow2.f32 %v2587_v29 }
 0x96f   :  { %3303 = vpow2.f32 %v2586_v31 }
 0x974   :  { %v3298_v32 = vpop.eup %3297 }
 0x975   :  { %v3300_v33 = vpop.eup %3299  ;;  %v1339_v35 = vadd.f32 1.0, %v3298_v32 }
 0x976   :  { %v1338_v40 = vadd.f32 1.0, %v3300_v33 }
 0x977   :  { %3305 = vrcp.f32 %v1339_v35  ;;  %v2593_v35 = vld [vmem:[%s4265_s12 + $0x1] ss:$0 sm:$0xff] }
 0x978   :  { %v3302_v34 = vpop.eup %3301  ;;  %3307 = vrcp.f32 %v1338_v40 }
 0x979   :  { %v3304_v42 = vpop.eup %3303  ;;  %v1341_v45 = vadd.f32 1.0, %v3302_v34 }
 0x97a   :  { %v1340_v46 = vadd.f32 1.0, %v3304_v42 }
 0x97b   :  { %3309 = vrcp.f32 %v1341_v45 }
 0x97c   :  { %3311 = vrcp.f32 %v1340_v46 }
 0x981   :  { %v3306_v1 = vpop.eup %3305 }
 0x982   :  { %v3308_v48 = vpop.eup %3307  ;;  %v1351_v24 = vmul.f32 %v3306_v1, %v2906_v22 }
 0x983   :  { %v1350_v49 = vmul.f32 %v3308_v48, %v1307_v25 }
 0x985   :  { %v3310_v52 = vpop.eup %3309  ;;  %2926 = vmatprep.mubr.msk.f32.mxu1 %vm1362_vm6, %v1350_v49 }
 0x986   :  { %v3312_v58 = vpop.eup %3311  ;;  %2927 = vmatmul.mubr.msk.f32.vlgmr.msra.gmra.mrb[18].mxu1 %vm1362_vm6, %v1351_v24  ;;  %v1353_v60 = vmul.f32 %v3310_v52, %v2909_v57 }
 0x987   :  { %v1352_v59 = vmul.f32 %v3312_v58, %v1317_v30 }
 0x989   :  { %2929 = vmatprep.mubr.msk.f32.mxu1 %vm1362_vm6, %v1352_v59 }
 0x98a   :  { %2930 = vmatmul.mubr.msk.f32.gmra.mrb[20].mxu1 %vm1362_vm6, %v1353_v60 }
 0xa59   :  { %v2928_v27 = vpop.f32.mrb[18].mxu1 }
 0xa5a   :  { %v4002_v62 = vadd.f32 %v2928_v27, %v3927_v14  ;;  %v1441_v2 = vpop.f32.mrb[19].mxu1 }
 0xa5b   :  { %v4005_v3 = vadd.f32 %v1441_v2, %v3930_v53 }
 0xa5c   :  { %v1467_v4 = vmul.f32 %v4002_v62, %v4002_v62 }
 0xa5d   :  { %v2931_v44 = vpop.f32.mrb[20].mxu1  ;;  %v1466_v5 = vmul.f32 %v4005_v3, %v4005_v3 }
 0xa5e   :  { %v4012_v6 = vadd.f32 %v2931_v44, %v3937_v19  ;;  %v1451_v7 = vpop.f32.mrb[21].mxu1  ;;  %v1473_v8 = vsel %vm199_vm3, %v1467_v4, 0.0 }
 0xa5f   :  { %v4016_v14 = vadd.f32 %v1451_v7, %v3941_v55  ;;  %1474 = vadd.xlane.f32.xlu0 %v1473_v8  ;;  %v1470_v53 = vsel %vm199_vm3, %v1466_v5, 0.0  ;;  %v2594_v55 = vld [vmem:[%s4261_s8 + $0x20] sm:$0xff] }
 0xa60   :  { %1471 = vadd.xlane.f32.xlu1 %v1470_v53  ;;  %v1469_v9 = vmul.f32 %v4012_v6, %v4012_v6  ;;  %v3124_v13 = vpack.c.bf16 %v2595_v12, %v2594_v55 }
 0xa61   :  { %v1468_v10 = vmul.f32 %v4016_v14, %v4016_v14 }
 0xa62   :  { %v1479_v11 = vsel %vm199_vm3, %v1469_v9, 0.0  ;;  %3125 = vmatprep.subr.bf16.mxu0 %v3124_v13 }
 0xa63   :  { %1480 = vadd.xlane.f32.xlu0 %v1479_v11  ;;  %v1476_v19 = vsel %vm199_vm3, %v1468_v10, 0.0  ;;  %3127 = vmatpush3.bf16.msra.mxu0 %v3124_v13 }
 0xa64   :  { %1477 = vadd.xlane.f32.xlu1 %v1476_v19  ;;  %3129 = vmatprep.subr.bf16.mxu0 %v3128_v16 }
 0xa67   :  { %3131 = vmatpush3.bf16.msra.mxu0 %v3128_v16 }
 0xaec   :  { %v1475_v17 = vpop.xlane.xlu0 %1474 }
 0xaed   :  { %v1483_v18 = vmul.f32 0.03125, %v1475_v17  ;;  %v1472_v20 = vpop.xlane.xlu1 %1471 }
 0xaee   :  { %v1482_v21 = vmul.f32 0.03125, %v1472_v20 }
 0xaef   :  { %v1487_v56 = vadd.f32 1e-06, %v1483_v18 }
 0xaf0   :  { %v1486_v22 = vadd.f32 1e-06, %v1482_v21  ;;  %v1481_v23 = vpop.xlane.xlu0 %1480 }
 0xaf1   :  { %3313 = vrsqrt.f32 %v1487_v56  ;;  %v1485_v25 = vmul.f32 0.03125, %v1481_v23  ;;  %v1478_v63 = vpop.xlane.xlu1 %1477 }
 0xaf2   :  { %3315 = vrsqrt.f32 %v1486_v22  ;;  %v1484_v57 = vmul.f32 0.03125, %v1478_v63 }
 0xaf3   :  { %v1489_v29 = vadd.f32 1e-06, %v1485_v25 }
 0xaf4   :  { %v1488_v30 = vadd.f32 1e-06, %v1484_v57 }
 0xaf5   :  { %3317 = vrsqrt.f32 %v1489_v29 }
 0xaf6   :  { %3319 = vrsqrt.f32 %v1488_v30 }
 0xafb   :  { %v3314_v31 = vpop.eup %3313 }
 0xafc   :  { %v3316_v32 = vpop.eup %3315  ;;  %v1495_v33 = vmul.f32 %v3314_v31, %v4002_v62 }
 0xafd   :  { %v1494_v40 = vmul.f32 %v3316_v32, %v4005_v3 }
 0xafe   :  { %v1505_v46 = vmul.f32 %v2593_v35, %v1495_v33 }
 0xaff   :  { %v3318_v34 = vpop.eup %3317  ;;  %v1504_v42 = vmul.f32 %v2593_v35, %v1494_v40 }
 0xb00   :  { %v3320_v45 = vpop.eup %3319  ;;  %v1497_v1 = vmul.f32 %v3318_v34, %v4012_v6 }
 0xb01   :  { %2940 = vmatprep.mubr.msk.f32.mxu0 %vm199_vm3, %v1504_v42  ;;  %v1496_v48 = vmul.f32 %v3320_v45, %v4016_v14 }
 0xb02   :  { %2941 = vmatmul.mubr.msk.f32.vlgmr.msra.gmra.mrb[16].mxu0 %vm199_vm3, %v1505_v46  ;;  %v1507_v24 = vmul.f32 %v2593_v35, %v1497_v1 }
 0xb03   :  { %v1506_v49 = vmul.f32 %v2593_v35, %v1496_v48 }
 0xb05   :  { %2943 = vmatprep.mubr.msk.f32.mxu0 %vm199_vm3, %v1506_v49 }
 0xb06   :  { %2944 = vmatmul.mubr.msk.f32.gmra.mrb[18].mxu0 %vm199_vm3, %v1507_v24 }
 0xbd5   :  { %v2942_v52 = vpop.f32.mrb[16].mxu0 }
 0xbd6   :  { %v1611_v58 = vmul.f32 %v2942_v52, %v3738_v38  ;;  %v1619_v59 = vmul.f32 %v2942_v52, %v3741_v39  ;;  %v1591_v60 = vpop.f32.mrb[17].mxu0 }
 0xbd7   :  { %v1610_v27 = vmul.f32 %v1591_v60, %v3738_v38  ;;  %v1618_v2 = vmul.f32 %v1591_v60, %v3741_v39  ;;  %v4052_v4 = vpack.i.bf16 %v2942_v52, %v1591_v60 }
 0xbd8   :  { %1615 = vst.msk [vmem:[#allocation3 + $0x8] sm:$0xff] %vm199_vm3, %v1611_v58  ;;  %1623 = vst.msk [vmem:[#allocation3 + $0x28] sm:$0xff] %vm199_vm3, %v1619_v59 }
 0xbd9   :  { %1614 = vst.msk [vmem:[#allocation3] sm:$0xff] %vm199_vm3, %v1610_v27  ;;  %1622 = vst.msk [vmem:[#allocation3 + $0x20] sm:$0xff] %vm199_vm3, %v1618_v2  ;;  %3228 = vrot.lane.b32.xlu1 %v4052_v4, %s3485_s0  ;;  %v2945_v44 = vpop.f32.mrb[18].mxu0 }
 0xbda   :  { %v1613_v5 = vmul.f32 %v2945_v44, %v3738_v38  ;;  %v1621_v7 = vmul.f32 %v2945_v44, %v3741_v39  ;;  %v1601_v8 = vpop.f32.mrb[19].mxu0 }
 0xbdb   :  { %v1612_v53 = vmul.f32 %v1601_v8, %v3738_v38  ;;  %v1620_v9 = vmul.f32 %v1601_v8, %v3741_v39  ;;  %v4064_v10 = vpack.i.bf16 %v2945_v44, %v1601_v8 }
 0xbdc   :  { %1617 = vst.msk [vmem:[#allocation3 + $0x18] sm:$0xff] %vm199_vm3, %v1613_v5  ;;  %1625 = vst.msk [vmem:[#allocation3 + $0x38] sm:$0xff] %vm199_vm3, %v1621_v7 }
 0xbdd   :  { %1616 = vst.msk [vmem:[#allocation3 + $0x10] sm:$0xff] %vm199_vm3, %v1612_v53  ;;  %1624 = vst.msk [vmem:[#allocation3 + $0x30] sm:$0xff] %vm199_vm3, %v1620_v9  ;;  %3233 = vrot.lane.b32.xlu0 %v4064_v10, %s3485_s0 }
 0xbdf   :  { %v1627_v16 = vld [vmem:[#allocation3 + $0x8] sm:$0xff] }
 0xbe0   :  { %v1626_v11 = vld [vmem:[#allocation3] sm:$0xff]  ;;  %v1631_v21 = vld [vmem:[#allocation3 + $0x28] sm:$0xff] }
 0xbe1   :  { %2954 = vmatprep.mubr.msk.f32.mxu0 %vm199_vm3, %v1626_v11  ;;  %v1630_v20 = vld [vmem:[#allocation3 + $0x20] sm:$0xff] }
 0xbe3   :  { %v1629_v18 = vld [vmem:[#allocation3 + $0x18] sm:$0xff] }
 0xbe4   :  { %v1628_v17 = vld [vmem:[#allocation3 + $0x10] sm:$0xff]  ;;  %v1633_v61 = vld [vmem:[#allocation3 + $0x38] sm:$0xff] }
 0xbe5   :  { %v1632_v56 = vld [vmem:[#allocation3 + $0x30] sm:$0xff] }
 0xc4b   :  { %v3229_v19 = vpop.permute.xlu1 %3228 }
 0xc4c   :  { %v3231_v38 = vunpack.i.h.bf16 %v3229_v19  ;;  %v3230_v55 = vunpack.i.l.bf16 %v3229_v19 }
 0xc4e   :  { %v3132_v39 = vpack.c.bf16 %v3231_v38, %v3230_v55 }
 0xc4f   :  { %v3234_v12 = vpop.permute.xlu0 %3233 }
 0xc50   :  { %v3236_v13 = vunpack.i.h.bf16 %v3234_v12  ;;  %v3235_v47 = vunpack.i.l.bf16 %v3234_v12  ;;  %3134 = vmatprep.subr.msk.bf16.mxu0 %vm3770_vm10, %v3132_v39 }
 0xc51   :  { %3137 = vmatpush3.bf16.xpose.msk.msra.mxu0 %vm3770_vm10, %v3132_v39 }
 0xc52   :  { %v3138_v15 = vpack.c.bf16 %v3236_v13, %v3235_v47 }
 0xc54   :  { %3140 = vmatprep.subr.msk.bf16.mxu0 %vm3770_vm10, %v3138_v15 }
 0xc59   :  { %3143 = vmatpush3.bf16.xpose.msk.msra.mxu0 %vm3770_vm10, %v3138_v15 }
 0xc60   :  { %2955 = vmatmul.mubr.msk.f32.vlgmr.msra.gmra.mrb[20].mxu0 %vm199_vm3, %v1627_v16 }
 0xc61   :  { %2957 = vmatprep.mubr.msk.f32.mxu0 %vm199_vm3, %v1628_v17 }
 0xc64   :  { %2958 = vmatmul.mubr.msk.f32.gmra.mrb[22].mxu0 %vm199_vm3, %v1629_v18 }
 0xc65   :  { %2960 = vmatprep.mubr.msk.f32.mxu0 %vm199_vm3, %v1630_v20 }
 0xc68   :  { %2961 = vmatmul.mubr.msk.f32.gmra.mrb[24].mxu0 %vm199_vm3, %v1631_v21 }
 0xc69   :  { %2963 = vmatprep.mubr.msk.f32.mxu0 %vm199_vm3, %v1632_v56 }
 0xc6c   :  { %2964 = vmatmul.mubr.msk.f32.gmra.mrb[26].mxu0 %vm199_vm3, %v1633_v61 }
 0xd33   :  { %v2956_v22 = vpop.f32.mrb[20].mxu0 }
 0xd34   :  { %v1750_v23 = vadd.f32 %v2956_v22, %v3814_v26  ;;  %v1744_v25 = vpop.f32.mrb[21].mxu0 }
 0xd35   :  { %v1745_v63 = vadd.f32 %v1744_v25, %v3816_v28 }
 0xd36   :  { %v1786_v57 = vsel %vm199_vm3, %v1750_v23, -inf }
 0xd37   :  { %1787 = vmax.xlane.f32.xlu0 %v1786_v57  ;;  %v2959_v29 = vpop.f32.mrb[22].mxu0  ;;  %v1783_v30 = vsel %vm199_vm3, %v1745_v63, -inf }
 0xd38   :  { %v1760_v31 = vadd.f32 %v2959_v29, %v3832_v41  ;;  %v1754_v32 = vpop.f32.mrb[23].mxu0  ;;  %1784 = vmax.xlane.f32.xlu1 %v1783_v30 }
 0xd39   :  { %v1755_v33 = vadd.f32 %v1754_v32, %v3835_v43 }
 0xd3a   :  { %v1792_v35 = vsel %vm199_vm3, %v1760_v31, -inf }
 0xd3b   :  { %1793 = vmax.xlane.f32.xlu0 %v1792_v35  ;;  %v2962_v40 = vpop.f32.mrb[24].mxu0  ;;  %v1789_v26 = vsel %vm199_vm3, %v1755_v33, -inf }
 0xd3c   :  { %v1770_v28 = vadd.f32 %v2962_v40, %v3848_v50  ;;  %v1764_v34 = vpop.f32.mrb[25].mxu0  ;;  %1790 = vmax.xlane.f32.xlu1 %v1789_v26 }
 0xd3d   :  { %v1765_v42 = vadd.f32 %v1764_v34, %v3851_v51 }
 0xd3e   :  { %v1798_v45 = vsel %vm199_vm3, %v1770_v28, -inf }
 0xd3f   :  { %1799 = vmax.xlane.f32.xlu0 %v1798_v45  ;;  %v2965_v41 = vpop.f32.mrb[26].mxu0  ;;  %v1795_v46 = vsel %vm199_vm3, %v1765_v42, -inf }
 0xd40   :  { %v1780_v43 = vadd.f32 %v2965_v41, %v3856_v54  ;;  %v1774_v1 = vpop.f32.mrb[27].mxu0  ;;  %1796 = vmax.xlane.f32.xlu1 %v1795_v46 }
 0xd41   :  { %v1775_v48 = vadd.f32 %v1774_v1, %v3859_v0 }
 0xd42   :  { %v1804_v49 = vsel %vm199_vm3, %v1780_v43, -inf }
 0xd43   :  { %1805 = vmax.xlane.f32.xlu0 %v1804_v49  ;;  %v1801_v50 = vsel %vm199_vm3, %v1775_v48, -inf }
 0xd44   :  { %1802 = vmax.xlane.f32.xlu1 %v1801_v50  ;;  %v2622_v50 = vld [vmem:[%s4262_s9 + $0x20] sm:$0xff] }
 0xdc4   :  { %v1788_v24 = vpop.xlane.xlu0 %1787 }
 0xdc5   :  { %v1808_v51 = vsub.f32 %v1750_v23, %v1788_v24  ;;  %v1785_v52 = vpop.xlane.xlu1 %1784  ;;  %v2623_v24 = vld [vmem:[%s4262_s9 + $0x28] sm:$0xff] }
 0xdc6   :  { %v1807_v58 = vsub.f32 %v1745_v63, %v1785_v52  ;;  %v3152_v52 = vpack.c.bf16 %v2623_v24, %v2622_v50 }
 0xdc7   :  { %v1817_v59 = vmul.f32 1.442695, %v1808_v51 }
 0xdc8   :  { %v1815_v60 = vmul.f32 1.442695, %v1807_v58  ;;  %v1794_v27 = vpop.xlane.xlu0 %1793 }
 0xdc9   :  { %3321 = vpow2.f32 %v1817_v59  ;;  %v1810_v2 = vsub.f32 %v1760_v31, %v1794_v27  ;;  %v1791_v54 = vpop.xlane.xlu1 %1790 }
 0xdca   :  { %3323 = vpow2.f32 %v1815_v60  ;;  %v1809_v44 = vsub.f32 %v1755_v33, %v1791_v54 }
 0xdcb   :  { %v1821_v5 = vmul.f32 1.442695, %v1810_v2 }
 0xdcc   :  { %v1819_v0 = vmul.f32 1.442695, %v1809_v44  ;;  %v1800_v7 = vpop.xlane.xlu0 %1799 }
 0xdcd   :  { %3325 = vpow2.f32 %v1821_v5  ;;  %v1812_v8 = vsub.f32 %v1770_v28, %v1800_v7  ;;  %v1797_v53 = vpop.xlane.xlu1 %1796 }
 0xdce   :  { %3327 = vpow2.f32 %v1819_v0  ;;  %v1811_v9 = vsub.f32 %v1765_v42, %v1797_v53 }
 0xdcf   :  { %v1825_v11 = vmul.f32 1.442695, %v1812_v8 }
 0xdd0   :  { %v1823_v19 = vmul.f32 1.442695, %v1811_v9  ;;  %v1806_v38 = vpop.xlane.xlu0 %1805 }
 0xdd1   :  { %3329 = vpow2.f32 %v1825_v11  ;;  %v1814_v55 = vsub.f32 %v1780_v43, %v1806_v38  ;;  %v1803_v39 = vpop.xlane.xlu1 %1802  ;;  %v2625_v38 = vld [vmem:[%s4262_s9 + $0x38] sm:$0xff] }
 0xdd2   :  { %3331 = vpow2.f32 %v1823_v19  ;;  %v1813_v12 = vsub.f32 %v1775_v48, %v1803_v39  ;;  %v2624_v19 = vld [vmem:[%s4262_s9 + $0x30] sm:$0xff] }
 0xdd3   :  { %v4104_v13 = vpop.eup %3321  ;;  %v1829_v47 = vmul.f32 1.442695, %v1814_v55  ;;  %v3156_v55 = vpack.c.bf16 %v2625_v38, %v2624_v19 }
 0xdd4   :  { %v3324_v15 = vpop.eup %3323  ;;  %v1827_v16 = vmul.f32 1.442695, %v1813_v12  ;;  %v1834_v17 = vsel %vm199_vm3, %v4104_v13, 0.0 }
 0xdd5   :  { %3333 = vpow2.f32 %v1829_v47  ;;  %1835 = vadd.xlane.f32.xlu0 %v1834_v17  ;;  %v1831_v18 = vsel %vm199_vm3, %v3324_v15, 0.0 }
 0xdd6   :  { %3335 = vpow2.f32 %v1827_v16  ;;  %1832 = vadd.xlane.f32.xlu1 %v1831_v18 }
 0xdd7   :  { %v4109_v20 = vpop.eup %3325 }
 0xdd8   :  { %v3328_v21 = vpop.eup %3327  ;;  %v1840_v56 = vsel %vm199_vm3, %v4109_v20, 0.0 }
 0xdd9   :  { %1841 = vadd.xlane.f32.xlu0 %v1840_v56  ;;  %v1837_v61 = vsel %vm199_vm3, %v3328_v21, 0.0 }
 0xdda   :  { %1838 = vadd.xlane.f32.xlu1 %v1837_v61 }
 0xddb   :  { %v4114_v22 = vpop.eup %3329 }
 0xddc   :  { %v3332_v23 = vpop.eup %3331  ;;  %v1846_v25 = vsel %vm199_vm3, %v4114_v22, 0.0 }
 0xddd   :  { %1847 = vadd.xlane.f32.xlu0 %v1846_v25  ;;  %v1843_v63 = vsel %vm199_vm3, %v3332_v23, 0.0 }
 0xdde   :  { %1844 = vadd.xlane.f32.xlu1 %v1843_v63 }
 0xddf   :  { %v4119_v57 = vpop.eup %3333 }
 0xde0   :  { %v3336_v29 = vpop.eup %3335  ;;  %v1852_v30 = vsel %vm199_vm3, %v4119_v57, 0.0 }
 0xde1   :  { %1853 = vadd.xlane.f32.xlu0 %v1852_v30  ;;  %v1849_v31 = vsel %vm199_vm3, %v3336_v29, 0.0 }
 0xde2   :  { %1850 = vadd.xlane.f32.xlu1 %v1849_v31 }
 0xdf3   :  { %3238 = vrot.lane.b32.xlu1 %v4052_v4, %s3487_s15 }
 0xdf7   :  { %3243 = vrot.lane.b32.xlu0 %v4064_v10, %s3487_s15 }
 0xe62   :  { %v1836_v32 = vpop.xlane.xlu0 %1835 }
 0xe63   :  { %v1833_v33 = vpop.xlane.xlu1 %1832 }
 0xe64   :  { %3337 = vrcp.f32 %v1833_v33 }
 0xe65   :  { %3339 = vrcp.f32 %v1836_v32 }
 0xe66   :  { %v1842_v35 = vpop.xlane.xlu0 %1841 }
 0xe67   :  { %v1839_v40 = vpop.xlane.xlu1 %1838 }
 0xe68   :  { %3341 = vrcp.f32 %v1839_v40 }
 0xe69   :  { %3343 = vrcp.f32 %v1842_v35 }
 0xe6a   :  { %v1848_v26 = vpop.xlane.xlu0 %1847 }
 0xe6b   :  { %v1845_v28 = vpop.xlane.xlu1 %1844 }
 0xe6c   :  { %3345 = vrcp.f32 %v1845_v28 }
 0xe6d   :  { %3347 = vrcp.f32 %v1848_v26 }
 0xe6e   :  { %v3338_v34 = vpop.eup %3337  ;;  %v1854_v42 = vpop.xlane.xlu0 %1853 }
 0xe6f   :  { %v1851_v45 = vpop.xlane.xlu1 %1850  ;;  %v1863_v41 = vmul.f32 %v3338_v34, %v3324_v15  ;;  %v3340_v58 = vpop.eup %3339 }
 0xe70   :  { %3349 = vrcp.f32 %v1851_v45  ;;  %v1864_v60 = vmul.f32 %v3340_v58, %v4104_v13 }
 0xe71   :  { %2974 = vmatprep.mubr.msk.f32.mxu1 %vm199_vm3, %v1863_v41  ;;  %3351 = vrcp.f32 %v1854_v42 }
 0xe72   :  { %v3244_v46 = vpop.permute.xlu0 %3243  ;;  %v3342_v59 = vpop.eup %3341 }
 0xe73   :  { %v3239_v4 = vpop.permute.xlu1 %3238  ;;  %v3246_v43 = vunpack.i.h.bf16 %v3244_v46  ;;  %v3245_v1 = vunpack.i.l.bf16 %v3244_v46  ;;  %v3344_v27 = vpop.eup %3343  ;;  %v1865_v2 = vmul.f32 %v3342_v59, %v3328_v21 }
 0xe74   :  { %v3241_v10 = vunpack.i.h.bf16 %v3239_v4  ;;  %v3240_v48 = vunpack.i.l.bf16 %v3239_v4  ;;  %v1866_v44 = vmul.f32 %v3344_v27, %v4109_v20  ;;  %v2633_v4 = vld [vmem:[%s4263_s10 + $0x28] sm:$0xff] }
 0xe75   :  { %v3148_v51 = vpack.c.bf16 %v3246_v43, %v3245_v1  ;;  %v2634_v1 = vld [vmem:[%s4263_s10 + $0x30] sm:$0xff] }
 0xe76   :  { %v3144_v49 = vpack.c.bf16 %v3241_v10, %v3240_v48  ;;  %v3346_v54 = vpop.eup %3345  ;;  %v2635_v10 = vld [vmem:[%s4263_s10 + $0x38] sm:$0xff] }
 0xe77   :  { %v3348_v5 = vpop.eup %3347  ;;  %v1867_v0 = vmul.f32 %v3346_v54, %v3332_v23  ;;  %v3164_v48 = vpack.c.bf16 %v2635_v10, %v2634_v1 }
 0xe78   :  { %3145 = vmatprep.subr.bf16.mxu1 %v3144_v49  ;;  %v1868_v8 = vmul.f32 %v3348_v5, %v4114_v22 }
 0xe79   :  { %3147 = vmatpush3.bf16.msra.mxu1 %v3144_v49 }
 0xe7a   :  { %3149 = vmatprep.subr.bf16.mxu1 %v3148_v51  ;;  %v3350_v7 = vpop.eup %3349 }
 0xe7b   :  { %v3352_v53 = vpop.eup %3351  ;;  %v1869_v9 = vmul.f32 %v3350_v7, %v3336_v29 }
 0xe7c   :  { %v1870_v11 = vmul.f32 %v3352_v53, %v4119_v57 }
 0xe7d   :  { %3151 = vmatpush3.bf16.msra.mxu1 %v3148_v51 }
 0xe7e   :  { %3153 = vmatprep.subr.bf16.mxu1 %v3152_v52 }
 0xe80   :  { %2975 = vmatmul.mubr.msk.f32.vlgmr.msra.gmra.mrb[22].mxu1 %vm199_vm3, %v1864_v60 }
 0xe81   :  { %2977 = vmatprep.mubr.msk.f32.mxu1 %vm199_vm3, %v1865_v2  ;;  %3155 = vmatpush3.bf16.msra.mxu1 %v3152_v52 }
 0xe82   :  { %3157 = vmatprep.subr.bf16.mxu1 %v3156_v55 }
 0xe84   :  { %2978 = vmatmul.mubr.msk.f32.gmra.mrb[24].mxu1 %vm199_vm3, %v1866_v44 }
 0xe85   :  { %2980 = vmatprep.mubr.msk.f32.mxu1 %vm199_vm3, %v1867_v0  ;;  %3159 = vmatpush3.bf16.msra.mxu1 %v3156_v55 }
 0xe88   :  { %2981 = vmatmul.mubr.msk.f32.gmra.mrb[26].mxu1 %vm199_vm3, %v1868_v8  ;;  %v2631_v8 = vld [vmem:[%s4266_s13 + $0x1] ss:$0 sm:$0xff] }
 0xe89   :  { %2983 = vmatprep.mubr.msk.f32.mxu1 %vm199_vm3, %v1869_v9 }
 0xe8c   :  { %2984 = vmatmul.mubr.msk.f32.gmra.mrb[28].mxu1 %vm199_vm3, %v1870_v11 }
 0xf53   :  { %v2976_v39 = vpop.f32.mrb[22].mxu1 }
 0xf54   :  { %v1973_v12 = vpop.f32.mrb[23].mxu1  ;;  %v2013_v16 = vmul.f32 %v2976_v39, %v3732_v36 }
 0xf55   :  { %v2012_v20 = vmul.f32 %v3732_v36, %v1973_v12 }
 0xf57   :  { %v2979_v13 = vpop.f32.mrb[24].mxu1 }
 0xf58   :  { %v1983_v47 = vpop.f32.mrb[25].mxu1  ;;  %v2015_v23 = vmul.f32 %v2979_v13, %v3732_v36 }
 0xf59   :  { %v2014_v57 = vmul.f32 %v3732_v36, %v1983_v47  ;;  %v2644_v47 = vld [vmem:[%s4264_s11 + $0x40] sm:$0xff] }
 0xf5b   :  { %v2982_v15 = vpop.f32.mrb[26].mxu1 }
 0xf5c   :  { %v2017_v17 = vmul.f32 %v2982_v15, %v3735_v37  ;;  %v1993_v18 = vpop.f32.mrb[27].mxu1  ;;  %v2645_v15 = vld [vmem:[%s4264_s11 + $0x48] sm:$0xff] }
 0xf5d   :  { %v2016_v21 = vmul.f32 %v3735_v37, %v1993_v18  ;;  %v2647_v18 = vld [vmem:[%s4264_s11 + $0x58] sm:$0xff] }
 0xf5e   :  { %v2021_v56 = vadd.f32 %v2017_v17, %v2013_v16  ;;  %v3168_v16 = vpack.c.bf16 %v2645_v15, %v2644_v47  ;;  %v2646_v17 = vld [vmem:[%s4264_s11 + $0x50] sm:$0xff] }
 0xf5f   :  { %v2020_v61 = vadd.f32 %v2016_v21, %v2012_v20  ;;  %v2985_v22 = vpop.f32.mrb[28].mxu1  ;;  %v3172_v20 = vpack.c.bf16 %v2647_v18, %v2646_v17  ;;  %v2648_v21 = vld [vmem:[%s4264_s11 + $0x60] sm:$0xff] }
 0xf60   :  { %v2019_v25 = vmul.f32 %v2985_v22, %v3735_v37  ;;  %v2003_v63 = vpop.f32.mrb[29].mxu1  ;;  %3169 = vmatprep.subr.bf16.mxu1 %v3168_v16  ;;  %v2650_v22 = vld [vmem:[%s4264_s11 + $0x70] sm:$0xff] }
 0xf61   :  { %v2018_v29 = vmul.f32 %v3735_v37, %v2003_v63  ;;  %2994 = vmatprep.mubr.msk.f32.mxu1 %vm199_vm3, %v2020_v61 }
 0xf62   :  { %v2023_v30 = vadd.f32 %v2019_v25, %v2015_v23  ;;  %2995 = vmatmul.mubr.msk.f32.vlgmr.msra.gmra.mrb[30].mxu1 %vm199_vm3, %v2021_v56  ;;  %v2649_v56 = vld [vmem:[%s4264_s11 + $0x68] sm:$0xff]  ;;  %v2651_v23 = vld [vmem:[%s4264_s11 + $0x78] sm:$0xff] }
 0xf63   :  { %v2022_v31 = vadd.f32 %v2018_v29, %v2014_v57  ;;  %3171 = vmatpush3.bf16.msra.mxu1 %v3168_v16  ;;  %v3176_v61 = vpack.c.bf16 %v2649_v56, %v2648_v21  ;;  %v3180_v25 = vpack.c.bf16 %v2651_v23, %v2650_v22 }
 0xf64   :  { %3173 = vmatprep.subr.bf16.mxu1 %v3172_v20 }
 0xf65   :  { %2997 = vmatprep.mubr.msk.f32.mxu1 %vm199_vm3, %v2022_v31 }
 0xf66   :  { %2998 = vmatmul.mubr.msk.f32.gmra.mrb[32].mxu1 %vm199_vm3, %v2023_v30 }
 0xf67   :  { %3175 = vmatpush3.bf16.msra.mxu1 %v3172_v20 }
 0xf68   :  { %3177 = vmatprep.subr.bf16.mxu1 %v3176_v61 }
 0xf6b   :  { %3179 = vmatpush3.bf16.msra.mxu1 %v3176_v61 }
 0xf6c   :  { %3181 = vmatprep.subr.bf16.mxu1 %v3180_v25 }
 0xf6f   :  { %3183 = vmatpush3.bf16.msra.mxu1 %v3180_v25 }
0x1035   :  { %v2996_v32 = vpop.f32.mrb[30].mxu1 }
0x1036   :  { %v2127_v33 = vadd.f32 %v2996_v32, %v4002_v62  ;;  %v2107_v35 = vpop.f32.mrb[31].mxu1 }
0x1037   :  { %v2126_v40 = vadd.f32 %v2107_v35, %v4005_v3 }
0x1038   :  { %v2133_v26 = vmul.f32 %v2127_v33, %v2127_v33 }
0x1039   :  { %v2999_v36 = vpop.f32.mrb[32].mxu1  ;;  %v2132_v28 = vmul.f32 %v2126_v40, %v2126_v40 }
0x103a   :  { %v4167_v37 = vadd.f32 %v2999_v36, %v4012_v6  ;;  %v2117_v34 = vpop.f32.mrb[33].mxu1  ;;  %v2139_v42 = vsel %vm199_vm3, %v2133_v26, 0.0 }
0x103b   :  { %v4171_v45 = vadd.f32 %v2117_v34, %v4016_v14  ;;  %2140 = vadd.xlane.f32.xlu0 %v2139_v42  ;;  %v2136_v41 = vsel %vm199_vm3, %v2132_v28, 0.0  ;;  %v2632_v14 = vld [vmem:[%s4263_s10 + $0x20] sm:$0xff] }
0x103c   :  { %2137 = vadd.xlane.f32.xlu1 %v2136_v41  ;;  %v2135_v62 = vmul.f32 %v4167_v37, %v4167_v37  ;;  %v3160_v43 = vpack.c.bf16 %v2633_v4, %v2632_v14 }
0x103d   :  { %v2134_v3 = vmul.f32 %v4171_v45, %v4171_v45 }
0x103e   :  { %v2145_v46 = vsel %vm199_vm3, %v2135_v62, 0.0  ;;  %3161 = vmatprep.subr.bf16.mxu0 %v3160_v43 }
0x103f   :  { %2146 = vadd.xlane.f32.xlu0 %v2145_v46  ;;  %v2142_v6 = vsel %vm199_vm3, %v2134_v3, 0.0  ;;  %3163 = vmatpush3.bf16.msra.mxu0 %v3160_v43 }
0x1040   :  { %2143 = vadd.xlane.f32.xlu1 %v2142_v6  ;;  %3165 = vmatprep.subr.bf16.mxu0 %v3164_v48 }
0x1043   :  { %3167 = vmatpush3.bf16.msra.mxu0 %v3164_v48 }
0x10c8   :  { %v2141_v49 = vpop.xlane.xlu0 %2140 }
0x10c9   :  { %v2149_v50 = vmul.f32 0.03125, %v2141_v49  ;;  %v2138_v24 = vpop.xlane.xlu1 %2137 }
0x10ca   :  { %v2148_v51 = vmul.f32 0.03125, %v2138_v24 }
0x10cb   :  { %v2153_v52 = vadd.f32 1e-06, %v2149_v50 }
0x10cc   :  { %v2152_v58 = vadd.f32 1e-06, %v2148_v51  ;;  %v2147_v59 = vpop.xlane.xlu0 %2146 }
0x10cd   :  { %3353 = vrsqrt.f32 %v2153_v52  ;;  %v2151_v60 = vmul.f32 0.03125, %v2147_v59  ;;  %v2144_v27 = vpop.xlane.xlu1 %2143 }
0x10ce   :  { %3355 = vrsqrt.f32 %v2152_v58  ;;  %v2150_v2 = vmul.f32 0.03125, %v2144_v27 }
0x10cf   :  { %v2155_v54 = vadd.f32 1e-06, %v2151_v60 }
0x10d0   :  { %v2154_v44 = vadd.f32 1e-06, %v2150_v2  ;;  %v2435_v2 = vld [vmem:[#allocation9] sm:$0xff] }
0x10d1   :  { %3357 = vrsqrt.f32 %v2155_v54  ;;  %v2436_v54 = vld [vmem:[#allocation9 + $0x8] sm:$0xff] }
0x10d2   :  { %3359 = vrsqrt.f32 %v2154_v44  ;;  %v2437_v44 = vld [vmem:[#allocation9 + $0x10] sm:$0xff] }
0x10d7   :  { %v3354_v5 = vpop.eup %3353 }
0x10d8   :  { %v3356_v0 = vpop.eup %3355  ;;  %v2161_v7 = vmul.f32 %v3354_v5, %v2127_v33  ;;  %v3184_v5 = vpack.c.bf16 %v2436_v54, %v2435_v2 }
0x10d9   :  { %v2160_v53 = vmul.f32 %v3356_v0, %v2126_v40  ;;  %v2438_v0 = vld [vmem:[#allocation9 + $0x18] sm:$0xff] }
0x10da   :  { %v2171_v38 = vmul.f32 %v2631_v8, %v2161_v7  ;;  %v3188_v7 = vpack.c.bf16 %v2438_v0, %v2437_v44  ;;  %3185 = vmatprep.subr.bf16.mxu0 %v3184_v5 }
0x10db   :  { %v3358_v9 = vpop.eup %3357  ;;  %v2170_v11 = vmul.f32 %v2631_v8, %v2160_v53 }
0x10dc   :  { %v3360_v19 = vpop.eup %3359  ;;  %v2163_v55 = vmul.f32 %v3358_v9, %v4167_v37 }
0x10dd   :  { %3008 = vmatprep.mubr.msk.f32.mxu0 %vm199_vm3, %v2170_v11  ;;  %v2162_v39 = vmul.f32 %v3360_v19, %v4171_v45 }
0x10de   :  { %3009 = vmatmul.mubr.msk.f32.vlgmr.msra.gmra.mrb[28].mxu0 %vm199_vm3, %v2171_v38  ;;  %v2173_v13 = vmul.f32 %v2631_v8, %v2163_v55  ;;  %v2656_v55 = vld [vmem:[%s4267_s14] ss:$0 sm:$0xff] }
0x10df   :  { %v2172_v12 = vmul.f32 %v2631_v8, %v2162_v39  ;;  %3187 = vmatpush3.bf16.msra.mxu0 %v3184_v5 }
0x10e0   :  { %3189 = vmatprep.subr.bf16.mxu0 %v3188_v7 }
0x10e1   :  { %3011 = vmatprep.mubr.msk.f32.mxu0 %vm199_vm3, %v2172_v12 }
0x10e2   :  { %3012 = vmatmul.mubr.msk.f32.gmra.mrb[30].mxu0 %vm199_vm3, %v2173_v13 }
0x10e3   :  { %3191 = vmatpush3.bf16.msra.mxu0 %v3188_v7 }
0x11b1   :  { %v3010_v63 = vpop.f32.mrb[28].mxu0 }
0x11b2   :  { %v2641_v57 = vmul.f32 -1.442695, %v3010_v63  ;;  %v2257_v29 = vpop.f32.mrb[29].mxu0 }
0x11b3   :  { %v2640_v30 = vmul.f32 -1.442695, %v2257_v29 }
0x11b4   :  { %3361 = vpow2.f32 %v2641_v57 }
0x11b5   :  { %3363 = vpow2.f32 %v2640_v30  ;;  %v3013_v31 = vpop.f32.mrb[30].mxu0 }
0x11b6   :  { %v2643_v32 = vmul.f32 -1.442695, %v3013_v31  ;;  %v2267_v33 = vpop.f32.mrb[31].mxu0 }
0x11b7   :  { %v2642_v35 = vmul.f32 -1.442695, %v2267_v33 }
0x11b8   :  { %3365 = vpow2.f32 %v2643_v32 }
0x11b9   :  { %3367 = vpow2.f32 %v2642_v35 }
0x11be   :  { %v3362_v40 = vpop.eup %3361 }
0x11bf   :  { %v3364_v26 = vpop.eup %3363  ;;  %v2289_v36 = vadd.f32 1.0, %v3362_v40 }
0x11c0   :  { %v2288_v28 = vadd.f32 1.0, %v3364_v26 }
0x11c1   :  { %3369 = vrcp.f32 %v2289_v36 }
0x11c2   :  { %v3366_v34 = vpop.eup %3365  ;;  %3371 = vrcp.f32 %v2288_v28 }
0x11c3   :  { %v3368_v42 = vpop.eup %3367  ;;  %v2291_v41 = vadd.f32 1.0, %v3366_v34 }
0x11c4   :  { %v2290_v62 = vadd.f32 1.0, %v3368_v42 }
0x11c5   :  { %3373 = vrcp.f32 %v2291_v41 }
0x11c6   :  { %3375 = vrcp.f32 %v2290_v62 }
0x11cb   :  { %v3370_v3 = vpop.eup %3369 }
0x11cc   :  { %v3372_v46 = vpop.eup %3371  ;;  %v2301_v14 = vmul.f32 %v3370_v3, %v3010_v63 }
0x11cd   :  { %v2300_v6 = vmul.f32 %v3372_v46, %v2257_v29 }
0x11cf   :  { %v3374_v4 = vpop.eup %3373  ;;  %3030 = vmatprep.mubr.msk.f32.mxu1 %vm1362_vm6, %v2300_v6 }
0x11d0   :  { %v3376_v43 = vpop.eup %3375  ;;  %3031 = vmatmul.mubr.msk.f32.vlgmr.msra.gmra.mrb[34].mxu1 %vm1362_vm6, %v2301_v14  ;;  %v2303_v10 = vmul.f32 %v3374_v4, %v3013_v31 }
0x11d1   :  { %v2302_v1 = vmul.f32 %v3376_v43, %v2267_v33 }
0x11d3   :  { %3033 = vmatprep.mubr.msk.f32.mxu1 %vm1362_vm6, %v2302_v1 }
0x11d4   :  { %3034 = vmatmul.mubr.msk.f32.gmra.mrb[36].mxu1 %vm1362_vm6, %v2303_v10 }
0x12a3   :  { %v3032_v48 = vpop.f32.mrb[34].mxu1 }
0x12a4   :  { %v2391_v49 = vpop.f32.mrb[35].mxu1 }
0x12a7   :  { %v3035_v50 = vpop.f32.mrb[36].mxu1 }
0x12a8   :  { %v2409_v24 = vadd.f32 %v3035_v50, %v4167_v37  ;;  %v2399_v51 = vpop.f32.mrb[37].mxu1 }
0x12a9   :  { %v2408_v52 = vadd.f32 %v2399_v51, %v4171_v45 }
0x12aa   :  { %v2412_v58 = vmul.f32 %v2409_v24, %v2409_v24 }
0x12ab   :  { %v2411_v59 = vmul.f32 %v2408_v52, %v2408_v52 }
0x12ac   :  { %v2416_v60 = vsel %vm199_vm3, %v2412_v58, 0.0 }
0x12ad   :  { %2417 = vadd.xlane.f32.xlu0 %v2416_v60  ;;  %v2413_v27 = vsel %vm199_vm3, %v2411_v59, 0.0 }
0x12ae   :  { %2414 = vadd.xlane.f32.xlu1 %v2413_v27 }
0x133a   :  { %v2418_v37 = vpop.xlane.xlu0 %2417 }
0x133b   :  { %v2420_v45 = vmul.f32 0.03125, %v2418_v37  ;;  %v2415_v8 = vpop.xlane.xlu1 %2414 }
0x133c   :  { %v2419_v53 = vmul.f32 0.03125, %v2415_v8 }
0x133d   :  { %v2422_v9 = vadd.f32 1e-06, %v2420_v45 }
0x133e   :  { %v2421_v11 = vadd.f32 1e-06, %v2419_v53 }
0x133f   :  { %3377 = vrsqrt.f32 %v2422_v9 }
0x1340   :  { %3379 = vrsqrt.f32 %v2421_v11 }
0x1349   :  { %v3378_v19 = vpop.eup %3377 }
0x134a   :  { %v3380_v38 = vpop.eup %3379  ;;  %v2426_v39 = vmul.f32 %v3378_v19, %v2409_v24 }
0x134b   :  { %v2425_v12 = vmul.f32 %v3380_v38, %v2408_v52 }
0x134c   :  { %v2434_v47 = vmul.f32 %v2656_v55, %v2426_v39 }
0x134d   :  { %v2433_v13 = vmul.f32 %v2656_v55, %v2425_v12 }
0x134f   :  { %3044 = vmatprep.mubr.msk.f32.mxu0 %vm199_vm3, %v2433_v13 }
0x1350   :  { %3045 = vmatmul.mubr.msk.f32.vlgmr.msra.gmra.mrb[32].mxu0 %vm199_vm3, %v2434_v47 }
0x1423   :  { %v3046_v15 = vpop.f32.mrb[32].mxu0 }
0x1424   :  { %2521 = vst [vmem:[#allocation10 + $0x8] sm:$0xff] %v3046_v15  ;;  %v2511_v16 = vpop.f32.mrb[33].mxu0 }
0x1425   :  { %2520 = vst [vmem:[#allocation10] sm:$0xff] %v2511_v16 }
0x1426   :  { %3458 = shalt.err (!%p3455_p0)
}
0x1427   :  { %s3459_s29 = scalar_lea.hbm %s4269_s16, 256 }
0x1428   :  { %p3460_p1 = scmp.ne.s32.totalorder %s4269_s16, %s3459_s29  ;;  %p3463_p2 = scmp.lt.u32.totalorder %s3459_s29, %s4269_s16 }
0x142a   :  { %p3465_p3 = pnand %p3463_p2, %p3460_p1 }
0x142c   :  { %3468 = shalt.err (!%p3465_p3)
}
0x142d   :  { %2533 = dma.vmem_to_hbm [thread:$0]  %s2528_s26, 256, %s4269_s16, [#allocation6], %s3477_s18, %s3477_s18, %s3478_s19  }
0x142e   :  { %3473 = dma.done.wait [#allocation6], 256  }
0x142f   :  { %3474 = vsyncadd [#allocation6], 4294967040 }
0x1430   :  { %2537 = vsyncpa [#allocation5], 1 }
0x1431   :  { %2538 = vsyncpa [#allocation8], 1 }
0x1432   :  { %2539 = vsyncpa [#allocation6], 1 }

</bundles_post_ra>
